<compile_context>
chip_gen: v7x
topology: tpu7x:2x2x1
jax: 0.10.0
libtpu: 0.0.40
codegen_flags: <defaults>
</compile_context>

<pallas_src>
import jax
import jax.numpy as jnp
from jax.experimental import pallas as pl
from jax.experimental.pallas import tpu as pltpu


# ---------------------------------------------------------------------------
# Sizes (same structure/ratios as the module; DIM shrunk from 30*672 for demo)
# ---------------------------------------------------------------------------
DIM = 512              # stand-in for 30 * 672
H1 = 3 * DIM // 4      # fc1  output (384)
H2 = DIM // 2          # fc11 output (256)
H3 = 300               # fc12 output (matches module)
Z = 25                 # fc21 output (matches module)

# Lane-dense (multiple-of-128) padded widths used inside the kernel.
H3_PAD = 384
Z_PAD = 128


# ---------------------------------------------------------------------------
# Fused Pallas kernel: the whole encoder forward in one invocation.
# All refs are whole-array VMEM blocks (no grid); intermediates stay in
# vregs/VMEM and only the (padded) mu tile is written back to HBM.
# ---------------------------------------------------------------------------
def _encoder_kernel(x_ref, w1_ref, b1_ref, w11_ref, b11_ref,
                    w12_ref, b12_ref, w21_ref, b21_ref, mu_ref):
    h = jnp.dot(x_ref[...], w1_ref[...], preferred_element_type=jnp.float32)
    h = jnp.maximum(h + b1_ref[...], 0.0)           # relu(fc1)

    h = jnp.dot(h, w11_ref[...], preferred_element_type=jnp.float32)
    h = jnp.maximum(h + b11_ref[...], 0.0)          # relu(fc11)

    h = jnp.dot(h, w12_ref[...], preferred_element_type=jnp.float32)
    h = jnp.maximum(h + b12_ref[...], 0.0)          # relu(fc12); padded cols stay 0

    h = jnp.dot(h, w21_ref[...], preferred_element_type=jnp.float32)
    h = jnp.maximum(h + b21_ref[...], 0.0)          # relu(fc21); padded cols stay 0

    mu_ref[...] = h.astype(mu_ref.dtype)


def encoder_forward(packed_params, x):
    """Pallas equivalent of Encoder.forward: returns mu of shape (batch, 25)."""
    x2 = x.reshape(-1, DIM)                          # x.view(-1, dim)
    m = x2.shape[0]

    vmem_spec = pl.BlockSpec(memory_space=pltpu.MemorySpace.VMEM)
    mu_padded = pl.pallas_call(
        _encoder_kernel,
        out_shape=jax.ShapeDtypeStruct((m, Z_PAD), x2.dtype),
        in_specs=[vmem_spec] * (1 + len(packed_params)),
        out_specs=vmem_spec,
    )(x2, *packed_params)
    return mu_padded[:, :Z]


# ---------------------------------------------------------------------------
# Parameters
# ---------------------------------------------------------------------------
def init_encoder_params(key):
    """PyTorch-like U(-1/sqrt(fan_in), 1/sqrt(fan_in)); weights stored (in, out)."""
    dims = [
        (DIM, H1),   # fc1
        (H1, H2),    # fc11
        (H2, H3),    # fc12
        (H3, Z),     # fc21
        (H3, Z),     # fc22 (dead in forward(); kept for structural parity)
    ]
    params = []
    for fan_in, fan_out in dims:
        key, kw, kb = jax.random.split(key, 3)
        bound = 1.0 / (fan_in ** 0.5)
        w = jax.random.uniform(kw, (fan_in, fan_out), jnp.float32, -bound, bound)
        b = jax.random.uniform(kb, (fan_out,), jnp.float32, -bound, bound)
        params.append((w, b))
    return params


def pack_encoder_params(params):
    """One-time layout prep: pad fc12/fc21 to lane-dense widths, biases -> (1, N)."""
    (w1, b1), (w11, b11), (w12, b12), (w21, b21), _ = params

    w12p = jnp.zeros((H2, H3_PAD), w12.dtype).at[:, :H3].set(w12)
    b12p = jnp.zeros((H3_PAD,), b12.dtype).at[:H3].set(b12)
    w21p = jnp.zeros((H3_PAD, Z_PAD), w21.dtype).at[:H3, :Z].set(w21)
    b21p = jnp.zeros((Z_PAD,), b21.dtype).at[:Z].set(b21)

    return (
        w1, b1.reshape(1, H1),
        w11, b11.reshape(1, H2),
        w12p, b12p.reshape(1, H3_PAD),
        w21p, b21p.reshape(1, Z_PAD),
    )


def encoder_forward_ref(params, x):
    """Pure-JAX reference (unpadded)."""
    (w1, b1), (w11, b11), (w12, b12), (w21, b21), _ = params
    h = x.reshape(-1, DIM)
    h = jnp.maximum(h @ w1 + b1, 0.0)
    h = jnp.maximum(h @ w11 + b11, 0.0)
    h = jnp.maximum(h @ w12 + b12, 0.0)
    return jnp.maximum(h @ w21 + b21, 0.0)


if __name__ == "__main__":
    key = jax.random.PRNGKey(0)
    key, kx = jax.random.split(key)

    params = init_encoder_params(key)
    packed = pack_encoder_params(params)

    # Input mimics the pre-view shape; 2*4*128 elems -> view(-1, DIM) = (2, DIM).
    x = jax.random.normal(kx, (2, 4, DIM // 4), jnp.float32)

    mu = jax.jit(encoder_forward)(packed, x)
    mu = jax.block_until_ready(mu)

    mu_ref = encoder_forward_ref(params, x)
    assert mu.shape == (2, Z), mu.shape
    assert jnp.allclose(mu, mu_ref, atol=1e-3, rtol=1e-3), "mismatch vs reference"

    print("KERNEL_OK")
</pallas_src>

<mosaic_0001>
module attributes {stable_mosaic.version = 11 : i64} {
  func.func @_encoder_kernel(%arg0: memref<2x512xf32, #tpu.memory_space<vmem>>, %arg1: memref<512x384xf32, #tpu.memory_space<vmem>>, %arg2: memref<1x384xf32, #tpu.memory_space<vmem>>, %arg3: memref<384x256xf32, #tpu.memory_space<vmem>>, %arg4: memref<1x256xf32, #tpu.memory_space<vmem>>, %arg5: memref<256x384xf32, #tpu.memory_space<vmem>>, %arg6: memref<1x384xf32, #tpu.memory_space<vmem>>, %arg7: memref<384x128xf32, #tpu.memory_space<vmem>>, %arg8: memref<1x128xf32, #tpu.memory_space<vmem>>, %arg9: memref<2x128xf32, #tpu.memory_space<vmem>>) attributes {dimension_semantics = [], scalar_prefetch = 0 : i64, scratch_operands = 0 : i64, tpu.core_type = #tpu.core_type<tc>} {
    %c0 = arith.constant 0 : index
    %c0_0 = arith.constant 0 : index
    %0 = vector.load %arg0[%c0, %c0_0] : memref<2x512xf32, #tpu.memory_space<vmem>>, vector<2x512xf32>
    %c0_1 = arith.constant 0 : index
    %c0_2 = arith.constant 0 : index
    %1 = vector.load %arg1[%c0_1, %c0_2] : memref<512x384xf32, #tpu.memory_space<vmem>>, vector<512x384xf32>
    %cst = arith.constant dense<0.000000e+00> : vector<2x384xf32>
    %2 = tpu.matmul %0, %1, %cst {dimension_numbers = #tpu.dot_dimension_numbers<[1], [0], [0], [1], [0, 0, 1, 1], [], []>} : vector<2x512xf32>, vector<512x384xf32>, vector<2x384xf32> -> vector<2x384xf32>
    %c0_3 = arith.constant 0 : index
    %c0_4 = arith.constant 0 : index
    %3 = vector.load %arg2[%c0_3, %c0_4] : memref<1x384xf32, #tpu.memory_space<vmem>>, vector<1x384xf32>
    %4 = vector.broadcast %3 : vector<1x384xf32> to vector<2x384xf32>
    %5 = arith.addf %2, %4 : vector<2x384xf32>
    %cst_5 = arith.constant 0.000000e+00 : f32
    %6 = vector.broadcast %cst_5 : f32 to vector<2x384xf32>
    %7 = arith.maximumf %5, %6 : vector<2x384xf32>
    %c0_6 = arith.constant 0 : index
    %c0_7 = arith.constant 0 : index
    %8 = vector.load %arg3[%c0_6, %c0_7] : memref<384x256xf32, #tpu.memory_space<vmem>>, vector<384x256xf32>
    %cst_8 = arith.constant dense<0.000000e+00> : vector<2x256xf32>
    %9 = tpu.matmul %7, %8, %cst_8 {dimension_numbers = #tpu.dot_dimension_numbers<[1], [0], [0], [1], [0, 0, 1, 1], [], []>} : vector<2x384xf32>, vector<384x256xf32>, vector<2x256xf32> -> vector<2x256xf32>
    %c0_9 = arith.constant 0 : index
    %c0_10 = arith.constant 0 : index
    %10 = vector.load %arg4[%c0_9, %c0_10] : memref<1x256xf32, #tpu.memory_space<vmem>>, vector<1x256xf32>
    %11 = vector.broadcast %10 : vector<1x256xf32> to vector<2x256xf32>
    %12 = arith.addf %9, %11 : vector<2x256xf32>
    %cst_11 = arith.constant 0.000000e+00 : f32
    %13 = vector.broadcast %cst_11 : f32 to vector<2x256xf32>
    %14 = arith.maximumf %12, %13 : vector<2x256xf32>
    %c0_12 = arith.constant 0 : index
    %c0_13 = arith.constant 0 : index
    %15 = vector.load %arg5[%c0_12, %c0_13] : memref<256x384xf32, #tpu.memory_space<vmem>>, vector<256x384xf32>
    %cst_14 = arith.constant dense<0.000000e+00> : vector<2x384xf32>
    %16 = tpu.matmul %14, %15, %cst_14 {dimension_numbers = #tpu.dot_dimension_numbers<[1], [0], [0], [1], [0, 0, 1, 1], [], []>} : vector<2x256xf32>, vector<256x384xf32>, vector<2x384xf32> -> vector<2x384xf32>
    %c0_15 = arith.constant 0 : index
    %c0_16 = arith.constant 0 : index
    %17 = vector.load %arg6[%c0_15, %c0_16] : memref<1x384xf32, #tpu.memory_space<vmem>>, vector<1x384xf32>
    %18 = vector.broadcast %17 : vector<1x384xf32> to vector<2x384xf32>
    %19 = arith.addf %16, %18 : vector<2x384xf32>
    %cst_17 = arith.constant 0.000000e+00 : f32
    %20 = vector.broadcast %cst_17 : f32 to vector<2x384xf32>
    %21 = arith.maximumf %19, %20 : vector<2x384xf32>
    %c0_18 = arith.constant 0 : index
    %c0_19 = arith.constant 0 : index
    %22 = vector.load %arg7[%c0_18, %c0_19] : memref<384x128xf32, #tpu.memory_space<vmem>>, vector<384x128xf32>
    %cst_20 = arith.constant dense<0.000000e+00> : vector<2x128xf32>
    %23 = tpu.matmul %21, %22, %cst_20 {dimension_numbers = #tpu.dot_dimension_numbers<[1], [0], [0], [1], [0, 0, 1, 1], [], []>} : vector<2x384xf32>, vector<384x128xf32>, vector<2x128xf32> -> vector<2x128xf32>
    %c0_21 = arith.constant 0 : index
    %c0_22 = arith.constant 0 : index
    %24 = vector.load %arg8[%c0_21, %c0_22] : memref<1x128xf32, #tpu.memory_space<vmem>>, vector<1x128xf32>
    %25 = vector.broadcast %24 : vector<1x128xf32> to vector<2x128xf32>
    %26 = arith.addf %23, %25 : vector<2x128xf32>
    %cst_23 = arith.constant 0.000000e+00 : f32
    %27 = vector.broadcast %cst_23 : f32 to vector<2x128xf32>
    %28 = arith.maximumf %26, %27 : vector<2x128xf32>
    %c0_24 = arith.constant 0 : index
    %c0_25 = arith.constant 0 : index
    %29 = vector.load %arg9[%c0_24, %c0_25] : memref<2x128xf32, #tpu.memory_space<vmem>>, vector<2x128xf32>
    tpu.vector_store %arg9[%c0_24, %c0_25], %28 {strides = array<i32>} : memref<2x128xf32, #tpu.memory_space<vmem>>, vector<2x128xf32>,
    return
  }
}

</mosaic_0001>

<bundles_post_ra>
// kernel: encoder_forward.1
= control target key start
LH: loop header
LB: loop body
LE: loop exit
PB: predicated region body
PF: predicated region fallthrough
CT: control target
= control target key end

     0   :  { %14 = vsyncpa [#allocation3], 0  ;;  %s2308_s0 = inlined_call_operand.vmem [shape: f32[2,512], index: 0, kind: input, shape index: {}]   ;;  %s2309_s1 = inlined_call_operand.hbm [shape: f32[512,384], index: 1, kind: input, shape index: {}]   ;;  %s2310_s2 = inlined_call_operand.vmem [shape: f32[1,384], index: 2, kind: input, shape index: {}]   ;;  %s2311_s3 = inlined_call_operand.hbm [shape: f32[384,256], index: 3, kind: input, shape index: {}]   ;;  %s2312_s4 = inlined_call_operand.vmem [shape: f32[1,256], index: 4, kind: input, shape index: {}]   ;;  %s2313_s5 = inlined_call_operand.hbm [shape: f32[256,384], index: 5, kind: input, shape index: {}]   ;;  %s2314_s6 = inlined_call_operand.vmem [shape: f32[1,384], index: 6, kind: input, shape index: {}]   ;;  %s2315_s7 = inlined_call_operand.hbm [shape: f32[384,128], index: 7, kind: input, shape index: {}]   ;;  %s2316_s8 = inlined_call_operand.vmem [shape: f32[1,128], index: 8, kind: input, shape index: {}]   ;;  %s2317_s9 = inlined_call_operand.hbm [shape: f32[2,128], index: 9, kind: output, shape index: {}]  }
   0x1   :  { %15 = vsyncpa [#allocation6], 0 }
   0x2   :  { %16 = vsyncpa [#allocation9], 0 }
   0x3   :  { %17 = vsyncpa [#allocation4], 0  ;;  %s2103_s30 = smov [#allocation5]   ;;  %s1985_s13 = scalar_lea.hbm %s2311_s3, 12288 }
   0x4   :  { %s39_s10 = sshll.u32 %s2103_s30, 4  ;;  %p1986_p0 = scmp.ne.s32.totalorder %s2311_s3, %s1985_s13  ;;  %s40_s10 = int_to_ptr.vmem [resolvable:$true] %s39_s10 }
   0x5   :  { %p1989_p1 = scmp.lt.u32.totalorder %s1985_s13, %s2311_s3 }
   0x7   :  { %p1991_p2 = pnand %p1989_p1, %p1986_p0 }
   0x9   :  { %1994 = shalt.err (!%p1991_p2)
}
   0xa   :  { %s1995_s18 = scalar_lea.vmem %s40_s10, 12288  ;;  %p2000_p4 = scmp.lt.s32.totalorder %s40_s10, %s40_s10 }
   0xb   :  { %p1996_p3 = scmp.ne.s32.totalorder %s40_s10, %s1995_s18  ;;  %p2001_p5 = scmp.lt.s32.totalorder %s1995_s18, %s1995_s18 }
   0xd   :  { %p2002_p6 = por %p2001_p5, %p2000_p4 }
   0xf   :  { %p2003_p7 = pnand %p2002_p6, %p1996_p3 }
  0x11   :  { %2006 = shalt.err (!%p2003_p7)
}
  0x12   :  { %s2104_s19 = smov 256   ;;  %s2105_s20 = smov 16  }
  0x13   :  { %45 = dma.hbm_to_vmem [thread:$0]  %s2311_s3, 12288, %s40_s10, [#allocation6], %s2104_s19, %s2104_s19, %s2105_s20  }
  0x14   :  { %s2106_s23 = smov [#allocation2]   ;;  %s2007_s27 = scalar_lea.hbm %s2309_s1, 24576 }
  0x15   :  { %s25_s24 = sshll.u32 %s2106_s23, 4  ;;  %p2008_p8 = scmp.ne.s32.totalorder %s2309_s1, %s2007_s27  ;;  %s26_s24 = int_to_ptr.vmem [resolvable:$true] %s25_s24 }
  0x16   :  { %p2011_p9 = scmp.lt.u32.totalorder %s2007_s27, %s2309_s1 }
  0x18   :  { %p2013_p10 = pnand %p2011_p9, %p2008_p8 }
  0x1a   :  { %2016 = shalt.err (!%p2013_p10)
}
  0x1b   :  { %s2017_s12 = scalar_lea.vmem %s26_s24, 24576  ;;  %p2022_p12 = scmp.lt.s32.totalorder %s26_s24, %s26_s24 }
  0x1c   :  { %p2018_p11 = scmp.ne.s32.totalorder %s26_s24, %s2017_s12  ;;  %p2023_p13 = scmp.lt.s32.totalorder %s2017_s12, %s2017_s12 }
  0x1e   :  { %p2024_p0 = por %p2023_p13, %p2022_p12 }
  0x20   :  { %p2025_p1 = pnand %p2024_p0, %p2018_p11 }
  0x22   :  { %2028 = shalt.err (!%p2025_p1)
}
  0x23   :  { %s2107_s3 = smov 384   ;;  %s2108_s10 = smov 24  }
  0x24   :  { %31 = dma.hbm_to_vmem [thread:$0]  %s2309_s1, 24576, %s26_s24, [#allocation3], %s2107_s3, %s2107_s3, %s2108_s10  }
  0x25   :  { %s2109_s15 = smov [#allocation7]   ;;  %s2110_s17 = smov [#allocation8]  }
  0x26   :  { %s53_s16 = sshll.u32 %s2109_s15, 4  ;;  %s67_s18 = sshll.u32 %s2110_s17, 4  ;;  %s54_s16 = int_to_ptr.vmem [resolvable:$true] %s53_s16  ;;  %s2192_s18 = int_to_ptr.vmem [resolvable:$true] %s67_s18 }
  0x27   :  { %s2029_s21 = scalar_lea.hbm %s2313_s5, 12288 }
  0x28   :  { %p2030_p2 = scmp.ne.s32.totalorder %s2313_s5, %s2029_s21  ;;  %p2033_p3 = scmp.lt.u32.totalorder %s2029_s21, %s2313_s5 }
  0x2a   :  { %p2035_p4 = pnand %p2033_p3, %p2030_p2 }
  0x2c   :  { %2038 = shalt.err (!%p2035_p4)
}
  0x2d   :  { %s2039_s1 = scalar_lea.vmem %s54_s16, 12288  ;;  %p2044_p6 = scmp.lt.s32.totalorder %s54_s16, %s54_s16 }
  0x2e   :  { %p2040_p5 = scmp.ne.s32.totalorder %s54_s16, %s2039_s1  ;;  %p2045_p7 = scmp.lt.s32.totalorder %s2039_s1, %s2039_s1 }
  0x30   :  { %p2046_p8 = por %p2045_p7, %p2044_p6 }
  0x32   :  { %p2047_p9 = pnand %p2046_p8, %p2040_p5 }
  0x34   :  { %2050 = shalt.err (!%p2047_p9)
}
  0x35   :  { %59 = dma.hbm_to_vmem [thread:$0]  %s2313_s5, 12288, %s54_s16, [#allocation6], %s2107_s3, %s2107_s3, %s2108_s10  }
  0x36   :  { %s2051_s30 = scalar_lea.hbm %s2315_s7, 6144 }
  0x37   :  { %p2052_p10 = scmp.ne.s32.totalorder %s2315_s7, %s2051_s30  ;;  %p2055_p11 = scmp.lt.u32.totalorder %s2051_s30, %s2315_s7 }
  0x39   :  { %p2057_p12 = pnand %p2055_p11, %p2052_p10 }
  0x3b   :  { %2060 = shalt.err (!%p2057_p12)
}
  0x3c   :  { %s2061_s15 = scalar_lea.vmem %s2192_s18, 6144  ;;  %p2066_p0 = scmp.lt.s32.totalorder %s2192_s18, %s2192_s18 }
  0x3d   :  { %p2062_p13 = scmp.ne.s32.totalorder %s2192_s18, %s2061_s15  ;;  %p2067_p1 = scmp.lt.s32.totalorder %s2061_s15, %s2061_s15 }
  0x3f   :  { %p2068_p2 = por %p2067_p1, %p2066_p0 }
  0x41   :  { %p2069_p3 = pnand %p2068_p2, %p2062_p13 }
  0x43   :  { %2072 = shalt.err (!%p2069_p3)
}
  0x44   :  { %s2111_s5 = smov 128   ;;  %s2112_s3 = smov 8  }
  0x45   :  { %73 = dma.hbm_to_vmem [thread:$0]  %s2315_s7, 6144, %s2192_s18, [#allocation9], %s2111_s5, %s2111_s5, %s2112_s3  }
  0x46   :  { %2095 = dma.done.wait [#allocation3], 24576  }
  0x47   :  { %2096 = vsyncadd [#allocation3], 4294942720 }
  0x48   :  { %2097 = dma.done.wait [#allocation6], 24576  }
  0x49   :  { %2098 = vsyncadd [#allocation6], 4294942720 }
  0x4a   :  { %2099 = dma.done.wait [#allocation9], 6144  }
  0x4b   :  { %2100 = vsyncadd [#allocation9], 4294961152  ;;  %v90_v0 = vld [vmem:[#allocation2 + $0x8] sm:$0xff]  ;;  %v93_v1 = vld [vmem:[#allocation2 + $0x20] sm:$0xff]  ;;  %v283_v25 = vlaneseq  ;;  %v2113_v26 = vmov 1983009808  }
  0x4c   :  { %v89_v2 = vld [vmem:[#allocation2] sm:$0xff]  ;;  %v1521_v3 = vpack.c.bf16 %v93_v1, %v90_v0  ;;  %v92_v4 = vld [vmem:[#allocation2 + $0x18] sm:$0xff]  ;;  %v99_v6 = vld [vmem:[#allocation2 + $0x50] sm:$0xff]  ;;  %v301_v27 = vunpack.c.l.s4 %v2113_v26  ;;  %vm2116_vm0 = vmmov 0   ;;  %s2117_s22 = smov [#allocation10]  }
  0x4d   :  { %v96_v5 = vld [vmem:[#allocation2 + $0x38] sm:$0xff]  ;;  %v1523_v7 = vpack.c.bf16 %v92_v4, %v89_v2  ;;  %v95_v9 = vld [vmem:[#allocation2 + $0x30] sm:$0xff]  ;;  %v98_v10 = vld [vmem:[#allocation2 + $0x48] sm:$0xff]  ;;  %v2223_v34 = vshrl.u32 %v283_v25, 7  ;;  %s1317_s23 = sshll.u32 %s2117_s22, 4  ;;  %s1318_s23 = int_to_ptr.vmem [resolvable:$true] %s1317_s23 }
  0x4e   :  { %v1525_v8 = vpack.c.bf16 %v99_v6, %v96_v5  ;;  %v102_v11 = vld [vmem:[#allocation2 + $0x68] sm:$0xff]  ;;  %1522 = vmatprep.subr.bf16.mxu0 %v1521_v3  ;;  %v105_v12 = vld [vmem:[#allocation2 + $0x80] sm:$0xff]  ;;  %v1527_v13 = vpack.c.bf16 %v98_v10, %v95_v9  ;;  %v104_v16 = vld [vmem:[#allocation2 + $0x78] sm:$0xff]  ;;  %v302_v35 = vunpack.c.0.s8 %v301_v27  ;;  %s2073_s25 = scalar_lea.vmem %s1318_s23, 32  ;;  %p2078_p5 = scmp.lt.s32.totalorder %s1318_s23, %s1318_s23 }
  0x4f   :  { %1524 = vmatpush1.bf16.msra.mxu0 %v1523_v7  ;;  %v1529_v14 = vpack.c.bf16 %v105_v12, %v102_v11  ;;  %v101_v15 = vld [vmem:[#allocation2 + $0x60] sm:$0xff]  ;;  %v108_v17 = vld [vmem:[#allocation2 + $0x98] sm:$0xff]  ;;  %v111_v18 = vld [vmem:[#allocation2 + $0xb0] sm:$0xff]  ;;  %p2074_p4 = scmp.ne.s32.totalorder %s1318_s23, %s2073_s25  ;;  %p2079_p6 = scmp.lt.s32.totalorder %s2073_s25, %s2073_s25 }
  0x50   :  { %1526 = vmatprep.subr.bf16.mxu0 %v1525_v8  ;;  %v1531_v19 = vpack.c.bf16 %v104_v16, %v101_v15  ;;  %v1533_v20 = vpack.c.bf16 %v111_v18, %v108_v17  ;;  %v107_v21 = vld [vmem:[#allocation2 + $0x90] sm:$0xff]  ;;  %v110_v22 = vld [vmem:[#allocation2 + $0xa8] sm:$0xff]  ;;  %v117_v24 = vld [vmem:[#allocation2 + $0xe0] sm:$0xff]  ;;  %v2226_v42 = vsub.s32 %v302_v35, %v2223_v34 }
  0x51   :  { %v114_v23 = vld [vmem:[#allocation2 + $0xc8] sm:$0xff]  ;;  %v1535_v28 = vpack.c.bf16 %v110_v22, %v107_v21  ;;  %v113_v30 = vld [vmem:[#allocation2 + $0xc0] sm:$0xff]  ;;  %v116_v31 = vld [vmem:[#allocation2 + $0xd8] sm:$0xff]  ;;  %p2080_p7 = por %p2079_p6, %p2078_p5 }
  0x52   :  { %v1537_v29 = vpack.c.bf16 %v117_v24, %v114_v23  ;;  %v120_v32 = vld [vmem:[#allocation2 + $0xf8] sm:$0xff]  ;;  %v123_v33 = vld [vmem:[#allocation2 + $0x110] sm:$0xff]  ;;  %v1539_v36 = vpack.c.bf16 %v116_v31, %v113_v30  ;;  %v122_v39 = vld [vmem:[#allocation2 + $0x108] sm:$0xff] }
  0x53   :  { %1528 = vmatpush1.bf16.msra.mxu0 %v1527_v13  ;;  %v1541_v37 = vpack.c.bf16 %v123_v33, %v120_v32  ;;  %v119_v38 = vld [vmem:[#allocation2 + $0xf0] sm:$0xff]  ;;  %v126_v40 = vld [vmem:[#allocation2 + $0x128] sm:$0xff]  ;;  %v129_v41 = vld [vmem:[#allocation2 + $0x140] sm:$0xff]  ;;  %p2081_p8 = pnand %p2080_p7, %p2074_p4 }
  0x54   :  { %1530 = vmatprep.subr.bf16.mxu0 %v1529_v14  ;;  %v1543_v43 = vpack.c.bf16 %v122_v39, %v119_v38  ;;  %v125_v44 = vld [vmem:[#allocation2 + $0x120] sm:$0xff]  ;;  %v1545_v45 = vpack.c.bf16 %v129_v41, %v126_v40  ;;  %v128_v46 = vld [vmem:[#allocation2 + $0x138] sm:$0xff]  ;;  %v135_v49 = vld [vmem:[#allocation2 + $0x170] sm:$0xff] }
  0x55   :  { %v132_v47 = vld [vmem:[#allocation2 + $0x158] sm:$0xff]  ;;  %v2231_v48 = vld [vmem:[%s2308_s0] sm:$0xff]  ;;  %v139_v51 = vld [vmem:[#allocation2 + $0x190] sm:$0xff]  ;;  %v1547_v55 = vpack.c.bf16 %v128_v46, %v125_v44 }
  0x56   :  { %v2235_v50 = vrot.slane %v2231_v48, %v2226_v42  ;;  %v142_v52 = vld [vmem:[#allocation2 + $0x1a8] sm:$0xff]  ;;  %v91_v54 = vld [vmem:[#allocation2 + $0x10] sm:$0xff]  ;;  %v1549_v60 = vpack.c.bf16 %v135_v49, %v132_v47  ;;  %v145_v63 = vld [vmem:[#allocation2 + $0x1c0] sm:$0xff] }
  0x57   :  { %1532 = vmatpush1.bf16.msra.mxu0 %v1531_v19  ;;  %v1649_v53 = vpack.c.bf16 %v142_v52, %v139_v51  ;;  %v131_v56 = vld [vmem:[#allocation2 + $0x150] sm:$0xff]  ;;  %v134_v57 = vld [vmem:[#allocation2 + $0x168] sm:$0xff]  ;;  %v148_v0 = vld [vmem:[#allocation2 + $0x1d8] sm:$0xff] }
  0x58   :  { %1534 = vmatprep.subr.bf16.mxu0 %v1533_v20  ;;  %v314_v58 = vcombine.high %v2235_v50, %v2235_v50  ;;  %v94_v59 = vld [vmem:[#allocation2 + $0x28] sm:$0xff]  ;;  %v141_v1 = vld [vmem:[#allocation2 + $0x1a0] sm:$0xff]  ;;  %v1653_v2 = vpack.c.bf16 %v148_v0, %v145_v63  ;;  %v100_v4 = vld [vmem:[#allocation2 + $0x58] sm:$0xff]  ;;  %v1551_v7 = vpack.c.bf16 %v134_v57, %v131_v56 }
  0x59   :  { %v138_v61 = vld [vmem:[#allocation2 + $0x188] sm:$0xff]  ;;  %1650 = vmatprep.subr.bf16.mxu1 %v1649_v53  ;;  %v1651_v62 = vpack.c.bf16 %v94_v59, %v91_v54  ;;  %v97_v3 = vld [vmem:[#allocation2 + $0x40] sm:$0xff]  ;;  %v151_v6 = vld [vmem:[#allocation2 + $0x1f0] sm:$0xff] }
  0x5a   :  { %384 = vmatprep.mubr.f32.mxu0 %v314_v58  ;;  %526 = vmatprep.mubr.f32.mxu1 %v314_v58  ;;  %v1655_v5 = vpack.c.bf16 %v100_v4, %v97_v3  ;;  %v137_v8 = vld [vmem:[#allocation2 + $0x180] sm:$0xff]  ;;  %v140_v9 = vld [vmem:[#allocation2 + $0x198] sm:$0xff]  ;;  %v154_v10 = vld [vmem:[#allocation2 + $0x208] sm:$0xff]  ;;  %v1553_v11 = vpack.c.bf16 %v141_v1, %v138_v61 }
  0x5b   :  { %1536 = vmatpush1.bf16.msra.mxu0 %v1535_v28  ;;  %1652 = vmatpush3.bf16.msra.mxu1 %v1651_v62  ;;  %v144_v12 = vld [vmem:[#allocation2 + $0x1b8] sm:$0xff]  ;;  %v1657_v13 = vpack.c.bf16 %v154_v10, %v151_v6  ;;  %v103_v14 = vld [vmem:[#allocation2 + $0x70] sm:$0xff]  ;;  %v106_v15 = vld [vmem:[#allocation2 + $0x88] sm:$0xff]  ;;  %v1555_v20 = vpack.c.bf16 %v140_v9, %v137_v8 }
  0x5c   :  { %1538 = vmatprep.subr.bf16.mxu0 %v1537_v29  ;;  %1654 = vmatprep.subr.bf16.mxu1 %v1653_v2  ;;  %v147_v16 = vld [vmem:[#allocation2 + $0x1d0] sm:$0xff]  ;;  %v157_v17 = vld [vmem:[#allocation2 + $0x220] sm:$0xff]  ;;  %v160_v18 = vld [vmem:[#allocation2 + $0x238] sm:$0xff]  ;;  %v1659_v19 = vpack.c.bf16 %v106_v15, %v103_v14 }
  0x5d   :  { %v143_v21 = vld [vmem:[#allocation2 + $0x1b0] sm:$0xff]  ;;  %v1661_v22 = vpack.c.bf16 %v160_v18, %v157_v17  ;;  %v109_v23 = vld [vmem:[#allocation2 + $0xa0] sm:$0xff]  ;;  %v112_v24 = vld [vmem:[#allocation2 + $0xb8] sm:$0xff]  ;;  %v1557_v25 = vpack.c.bf16 %v147_v16, %v144_v12 }
  0x5e   :  { %v146_v26 = vld [vmem:[#allocation2 + $0x1c8] sm:$0xff]  ;;  %v163_v27 = vld [vmem:[#allocation2 + $0x250] sm:$0xff]  ;;  %v153_v30 = vld [vmem:[#allocation2 + $0x200] sm:$0xff]  ;;  %v1663_v31 = vpack.c.bf16 %v112_v24, %v109_v23 }
  0x5f   :  { %1540 = vmatpush1.bf16.msra.mxu0 %v1539_v36  ;;  %1656 = vmatpush3.bf16.msra.mxu1 %v1655_v5  ;;  %v166_v28 = vld [vmem:[#allocation2 + $0x268] sm:$0xff]  ;;  %v1559_v32 = vpack.c.bf16 %v146_v26, %v143_v21  ;;  %v149_v33 = vld [vmem:[#allocation2 + $0x1e0] sm:$0xff]  ;;  %v115_v36 = vld [vmem:[#allocation2 + $0xd0] sm:$0xff] }
  0x60   :  { %1542 = vmatprep.subr.bf16.mxu0 %v1541_v37  ;;  %1658 = vmatprep.subr.bf16.mxu1 %v1657_v13  ;;  %v150_v29 = vld [vmem:[#allocation2 + $0x1e8] sm:$0xff]  ;;  %v1665_v35 = vpack.c.bf16 %v166_v28, %v163_v27  ;;  %v152_v39 = vld [vmem:[#allocation2 + $0x1f8] sm:$0xff]  ;;  %v169_v40 = vld [vmem:[#allocation2 + $0x280] sm:$0xff] }
  0x61   :  { %v118_v37 = vld [vmem:[#allocation2 + $0xe8] sm:$0xff]  ;;  %v1561_v38 = vpack.c.bf16 %v153_v30, %v150_v29  ;;  %v172_v41 = vld [vmem:[#allocation2 + $0x298] sm:$0xff]  ;;  %v159_v44 = vld [vmem:[#allocation2 + $0x230] sm:$0xff]  ;;  %v1563_v46 = vpack.c.bf16 %v152_v39, %v149_v33 }
  0x62   :  { %v155_v47 = vld [vmem:[#allocation2 + $0x210] sm:$0xff]  ;;  %v1669_v49 = vpack.c.bf16 %v172_v41, %v169_v40  ;;  %v121_v51 = vld [vmem:[#allocation2 + $0x100] sm:$0xff]  ;;  %v124_v52 = vld [vmem:[#allocation2 + $0x118] sm:$0xff] }
  0x63   :  { %1544 = vmatpush1.bf16.msra.mxu0 %v1543_v43  ;;  %1660 = vmatpush3.bf16.msra.mxu1 %v1659_v19  ;;  %v156_v43 = vld [vmem:[#allocation2 + $0x218] sm:$0xff]  ;;  %v158_v54 = vld [vmem:[#allocation2 + $0x228] sm:$0xff]  ;;  %v165_v58 = vld [vmem:[#allocation2 + $0x260] sm:$0xff]  ;;  %v1671_v59 = vpack.c.bf16 %v124_v52, %v121_v51 }
  0x64   :  { %1546 = vmatprep.subr.bf16.mxu0 %v1545_v45  ;;  %1662 = vmatprep.subr.bf16.mxu1 %v1661_v22  ;;  %v1667_v45 = vpack.c.bf16 %v118_v37, %v115_v36  ;;  %v1565_v53 = vpack.c.bf16 %v159_v44, %v156_v43  ;;  %v178_v56 = vld [vmem:[#allocation2 + $0x2c8] sm:$0xff]  ;;  %v161_v61 = vld [vmem:[#allocation2 + $0x240] sm:$0xff]  ;;  %v127_v63 = vld [vmem:[#allocation2 + $0x130] sm:$0xff] }
  0x65   :  { %v162_v57 = vld [vmem:[#allocation2 + $0x248] sm:$0xff]  ;;  %v164_v2 = vld [vmem:[#allocation2 + $0x258] sm:$0xff]  ;;  %v181_v3 = vld [vmem:[#allocation2 + $0x2e0] sm:$0xff] }
  0x66   :  { %v130_v0 = vld [vmem:[#allocation2 + $0x148] sm:$0xff]  ;;  %v1569_v1 = vpack.c.bf16 %v165_v58, %v162_v57  ;;  %v184_v4 = vld [vmem:[#allocation2 + $0x2f8] sm:$0xff]  ;;  %v171_v6 = vld [vmem:[#allocation2 + $0x290] sm:$0xff]  ;;  %v1571_v9 = vpack.c.bf16 %v164_v2, %v161_v61 }
  0x67   :  { %1548 = vmatpush1.bf16.msra.mxu0 %v1547_v55  ;;  %1664 = vmatpush3.bf16.msra.mxu1 %v1663_v31  ;;  %v175_v55 = vld [vmem:[#allocation2 + $0x2b0] sm:$0xff]  ;;  %v168_v5 = vld [vmem:[#allocation2 + $0x278] sm:$0xff]  ;;  %v1675_v8 = vpack.c.bf16 %v130_v0, %v127_v63  ;;  %v133_v12 = vld [vmem:[#allocation2 + $0x160] sm:$0xff] }
  0x68   :  { %1550 = vmatprep.subr.bf16.mxu0 %v1549_v60  ;;  %1666 = vmatprep.subr.bf16.mxu1 %v1665_v35  ;;  %v1567_v60 = vpack.c.bf16 %v158_v54, %v155_v47  ;;  %v1673_v62 = vpack.c.bf16 %v178_v56, %v175_v55  ;;  %v167_v10 = vld [vmem:[#allocation2 + $0x270] sm:$0xff]  ;;  %v136_v13 = vld [vmem:[#allocation2 + $0x178] sm:$0xff]  ;;  %v1573_v14 = vpack.c.bf16 %v171_v6, %v168_v5  ;;  %v170_v15 = vld [vmem:[#allocation2 + $0x288] sm:$0xff] }
  0x69   :  { %v235_v16 = vld [vmem:[#allocation2 + $0x490] sm:$0xff]  ;;  %v238_v17 = vld [vmem:[#allocation2 + $0x4a8] sm:$0xff]  ;;  %v177_v19 = vld [vmem:[#allocation2 + $0x2c0] sm:$0xff]  ;;  %v1575_v21 = vpack.c.bf16 %v170_v15, %v167_v10 }
  0x6a   :  { %v174_v18 = vld [vmem:[#allocation2 + $0x2a8] sm:$0xff]  ;;  %v173_v22 = vld [vmem:[#allocation2 + $0x2a0] sm:$0xff]  ;;  %v1681_v23 = vpack.c.bf16 %v238_v17, %v235_v16  ;;  %v187_v24 = vld [vmem:[#allocation2 + $0x310] sm:$0xff] }
  0x6b   :  { %1552 = vmatpush1.bf16.msra.mxu0 %v1551_v7  ;;  %1668 = vmatpush3.bf16.msra.mxu1 %v1667_v45  ;;  %v299_v7 = vcombine.high %v2231_v48, %v2231_v48  ;;  %v1577_v26 = vpack.c.bf16 %v177_v19, %v174_v18  ;;  %v176_v27 = vld [vmem:[#allocation2 + $0x2b8] sm:$0xff]  ;;  %v241_v28 = vld [vmem:[#allocation2 + $0x4c0] sm:$0xff]  ;;  %v183_v31 = vld [vmem:[#allocation2 + $0x2f0] sm:$0xff] }
  0x6c   :  { %1554 = vmatprep.subr.bf16.mxu0 %v1553_v11  ;;  %1670 = vmatprep.subr.bf16.mxu1 %v1669_v49  ;;  %v1677_v11 = vpack.c.bf16 %v184_v4, %v181_v3  ;;  %v244_v29 = vld [vmem:[#allocation2 + $0x4d8] sm:$0xff]  ;;  %v1579_v33 = vpack.c.bf16 %v176_v27, %v173_v22  ;;  %v179_v35 = vld [vmem:[#allocation2 + $0x2d0] sm:$0xff]  ;;  %v193_v37 = vld [vmem:[#allocation2 + $0x340] sm:$0xff] }
  0x6d   :  { %v2242_v48 = vrot.slane %v299_v7, %v2226_v42  ;;  %v180_v30 = vld [vmem:[#allocation2 + $0x2d8] sm:$0xff]  ;;  %v1685_v36 = vpack.c.bf16 %v244_v29, %v241_v28  ;;  %v182_v40 = vld [vmem:[#allocation2 + $0x2e8] sm:$0xff]  ;;  %v247_v41 = vld [vmem:[#allocation2 + $0x4f0] sm:$0xff] }
  0x6e   :  { %v1581_v39 = vpack.c.bf16 %v183_v31, %v180_v30  ;;  %v250_v43 = vld [vmem:[#allocation2 + $0x508] sm:$0xff]  ;;  %v189_v45 = vld [vmem:[#allocation2 + $0x320] sm:$0xff]  ;;  %v1583_v47 = vpack.c.bf16 %v182_v40, %v179_v35  ;;  %v199_v52 = vld [vmem:[#allocation2 + $0x370] sm:$0xff] }
  0x6f   :  { %1556 = vmatpush1.bf16.msra.mxu0 %v1555_v20  ;;  %1672 = vmatpush3.bf16.msra.mxu1 %v1671_v59  ;;  %v1679_v20 = vpack.c.bf16 %v136_v13, %v133_v12  ;;  %v2246_v42 = vcombine.high %v2242_v48, %v2242_v48  ;;  %v186_v44 = vld [vmem:[#allocation2 + $0x308] sm:$0xff]  ;;  %v185_v49 = vld [vmem:[#allocation2 + $0x300] sm:$0xff]  ;;  %v1689_v51 = vpack.c.bf16 %v250_v43, %v247_v41  ;;  %v188_v55 = vld [vmem:[#allocation2 + $0x318] sm:$0xff] }
  0x70   :  { %1558 = vmatprep.subr.bf16.mxu0 %v1557_v25  ;;  %1674 = vmatprep.subr.bf16.mxu1 %v1673_v62  ;;  %v190_v25 = vld [vmem:[#allocation2 + $0x328] sm:$0xff]  ;;  %v1585_v54 = vpack.c.bf16 %v189_v45, %v186_v44  ;;  %v253_v56 = vld [vmem:[#allocation2 + $0x520] sm:$0xff]  ;;  %v256_v57 = vld [vmem:[#allocation2 + $0x538] sm:$0xff]  ;;  %v1587_v61 = vpack.c.bf16 %v188_v55, %v185_v49 }
  0x71   :  { %v192_v58 = vld [vmem:[#allocation2 + $0x338] sm:$0xff]  ;;  %v195_v59 = vld [vmem:[#allocation2 + $0x350] sm:$0xff]  ;;  %v1693_v63 = vpack.c.bf16 %v256_v57, %v253_v56  ;;  %v205_v0 = vld [vmem:[#allocation2 + $0x3a0] sm:$0xff] }
  0x72   :  { %v191_v62 = vld [vmem:[#allocation2 + $0x330] sm:$0xff]  ;;  %v1589_v2 = vpack.c.bf16 %v195_v59, %v192_v58  ;;  %v194_v3 = vld [vmem:[#allocation2 + $0x348] sm:$0xff]  ;;  %v201_v7 = vld [vmem:[#allocation2 + $0x380] sm:$0xff] }
  0x73   :  { %1560 = vmatpush1.bf16.msra.mxu0 %v1559_v32  ;;  %1676 = vmatpush3.bf16.msra.mxu1 %v1675_v8  ;;  %v1683_v32 = vpack.c.bf16 %v190_v25, %v187_v24  ;;  %v259_v4 = vld [vmem:[#allocation2 + $0x550] sm:$0xff]  ;;  %v262_v5 = vld [vmem:[#allocation2 + $0x568] sm:$0xff]  ;;  %v197_v10 = vld [vmem:[#allocation2 + $0x360] sm:$0xff] }
  0x74   :  { %1562 = vmatprep.subr.bf16.mxu0 %v1561_v38  ;;  %1678 = vmatprep.subr.bf16.mxu1 %v1677_v11  ;;  %v196_v38 = vld [vmem:[#allocation2 + $0x358] sm:$0xff]  ;;  %v198_v6 = vld [vmem:[#allocation2 + $0x368] sm:$0xff]  ;;  %v1697_v11 = vpack.c.bf16 %v262_v5, %v259_v4  ;;  %v211_v12 = vld [vmem:[#allocation2 + $0x3d0] sm:$0xff] }
  0x75   :  { %v214_v13 = vld [vmem:[#allocation2 + $0x3e8] sm:$0xff]  ;;  %v200_v15 = vld [vmem:[#allocation2 + $0x378] sm:$0xff]  ;;  %v265_v16 = vld [vmem:[#allocation2 + $0x580] sm:$0xff] }
  0x76   :  { %v268_v17 = vld [vmem:[#allocation2 + $0x598] sm:$0xff]  ;;  %v207_v19 = vld [vmem:[#allocation2 + $0x3b0] sm:$0xff]  ;;  %v274_v28 = vld [vmem:[#allocation2 + $0x5c8] sm:$0xff] }
  0x77   :  { %1564 = vmatpush1.bf16.msra.mxu0 %v1563_v46  ;;  %1680 = vmatpush3.bf16.msra.mxu1 %v1679_v20  ;;  %v1687_v46 = vpack.c.bf16 %v196_v38, %v193_v37  ;;  %v204_v18 = vld [vmem:[#allocation2 + $0x398] sm:$0xff]  ;;  %v1595_v20 = vpack.c.bf16 %v200_v15, %v197_v10  ;;  %v1701_v22 = vpack.c.bf16 %v268_v17, %v265_v16  ;;  %v271_v27 = vld [vmem:[#allocation2 + $0x5b0] sm:$0xff]  ;;  %v210_v29 = vld [vmem:[#allocation2 + $0x3c8] sm:$0xff] }
  0x78   :  { %1566 = vmatprep.subr.bf16.mxu0 %v1565_v53  ;;  %1682 = vmatprep.subr.bf16.mxu1 %v1681_v23  ;;  %v202_v53 = vld [vmem:[#allocation2 + $0x388] sm:$0xff]  ;;  %v217_v23 = vld [vmem:[#allocation2 + $0x400] sm:$0xff]  ;;  %v220_v24 = vld [vmem:[#allocation2 + $0x418] sm:$0xff]  ;;  %v1597_v25 = vpack.c.bf16 %v207_v19, %v204_v18 }
  0x79   :  { %v213_v30 = vld [vmem:[#allocation2 + $0x3e0] sm:$0xff]  ;;  %v1703_v31 = vpack.c.bf16 %v220_v24, %v217_v23  ;;  %v223_v35 = vld [vmem:[#allocation2 + $0x430] sm:$0xff]  ;;  %v212_v38 = vld [vmem:[#allocation2 + $0x3d8] sm:$0xff] }
  0x7a   :  { %527 = vmatmul.mubr.f32.vlgmr.msra.gmra.mrb[0].mxu1 %v2235_v50  ;;  %v1601_v37 = vpack.c.bf16 %v213_v30, %v210_v29  ;;  %v280_v40 = vld [vmem:[#allocation2 + $0x5f8] sm:$0xff]  ;;  %v219_v43 = vld [vmem:[#allocation2 + $0x410] sm:$0xff]  ;;  %v229_v49 = vld [vmem:[#allocation2 + $0x460] sm:$0xff] }
  0x7b   :  { %1568 = vmatpush1.bf16.msra.mxu0 %v1567_v60  ;;  %1684 = vmatpush3.bf16.msra.mxu1 %v1683_v32  ;;  %v1691_v60 = vpack.c.bf16 %v202_v53, %v199_v52  ;;  %v216_v41 = vld [vmem:[#allocation2 + $0x3f8] sm:$0xff]  ;;  %v218_v53 = vld [vmem:[#allocation2 + $0x408] sm:$0xff]  ;;  %v225_v57 = vld [vmem:[#allocation2 + $0x440] sm:$0xff] }
  0x7c   :  { %1570 = vmatprep.subr.bf16.mxu0 %v1569_v1  ;;  %596 = vmatprep.mubr.f32.mxu1 %v2246_v42  ;;  %v208_v1 = vld [vmem:[#allocation2 + $0x3b8] sm:$0xff]  ;;  %v1605_v52 = vpack.c.bf16 %v219_v43, %v216_v41  ;;  %v222_v56 = vld [vmem:[#allocation2 + $0x428] sm:$0xff]  ;;  %v231_v5 = vld [vmem:[#allocation2 + $0x470] sm:$0xff] }
  0x7d   :  { %1686 = vmatprep.subr.bf16.mxu1 %v1685_v36  ;;  %v1695_v8 = vpack.c.bf16 %v208_v1, %v205_v0  ;;  %v226_v36 = vld [vmem:[#allocation2 + $0x448] sm:$0xff]  ;;  %v608_v55 = vld [vmem:[#allocation5 + $0x18] sm:$0xff]  ;;  %v1609_v0 = vpack.c.bf16 %v225_v57, %v222_v56  ;;  %v609_v10 = vld [vmem:[#allocation5 + $0x20] sm:$0xff] }
  0x7e   :  { %v1707_v44 = vpack.c.bf16 %v226_v36, %v223_v35  ;;  %v224_v1 = vld [vmem:[#allocation2 + $0x438] sm:$0xff]  ;;  %v234_v16 = vld [vmem:[#allocation2 + $0x488] sm:$0xff]  ;;  %v237_v17 = vld [vmem:[#allocation2 + $0x4a0] sm:$0xff] }
  0x7f   :  { %1572 = vmatpush1.bf16.msra.mxu0 %v1571_v9  ;;  %1688 = vmatpush3.bf16.msra.mxu1 %v1687_v46  ;;  %v1591_v9 = vpack.c.bf16 %v194_v3, %v191_v62  ;;  %v215_v46 = vld [vmem:[#allocation2 + $0x3f0] sm:$0xff]  ;;  %v605_v62 = vld [vmem:[#allocation5] sm:$0xff]  ;;  %v612_v3 = vld [vmem:[#allocation5 + $0x38] sm:$0xff]  ;;  %v1617_v23 = vpack.c.bf16 %v237_v17, %v234_v16 }
  0x80   :  { %1574 = vmatprep.subr.bf16.mxu0 %v1573_v14  ;;  %1690 = vmatprep.subr.bf16.mxu1 %v1689_v51  ;;  %v1593_v14 = vpack.c.bf16 %v201_v7, %v198_v6  ;;  %v232_v51 = vld [vmem:[#allocation2 + $0x478] sm:$0xff]  ;;  %v1607_v59 = vpack.c.bf16 %v218_v53, %v215_v46  ;;  %v242_v36 = vld [vmem:[#allocation2 + $0x4c8] sm:$0xff]  ;;  %v621_v46 = vld [vmem:[#allocation5 + $0x80] sm:$0xff] }
  0x81   :  { %v1711_v58 = vpack.c.bf16 %v232_v51, %v229_v49  ;;  %v228_v4 = vld [vmem:[#allocation2 + $0x458] sm:$0xff] }
  0x82   :  { %v616_v15 = vld [vmem:[#allocation5 + $0x58] sm:$0xff] }
  0x83   :  { %1576 = vmatpush1.bf16.msra.mxu0 %v1575_v21  ;;  %1692 = vmatpush3.bf16.msra.mxu1 %v1691_v60  ;;  %v203_v21 = vld [vmem:[#allocation2 + $0x390] sm:$0xff]  ;;  %v221_v60 = vld [vmem:[#allocation2 + $0x420] sm:$0xff]  ;;  %v236_v24 = vld [vmem:[#allocation2 + $0x498] sm:$0xff] }
  0x84   :  { %1578 = vmatprep.subr.bf16.mxu0 %v1577_v26  ;;  %1694 = vmatprep.subr.bf16.mxu1 %v1693_v63  ;;  %v206_v26 = vld [vmem:[#allocation2 + $0x3a8] sm:$0xff]  ;;  %v607_v63 = vld [vmem:[#allocation5 + $0x10] sm:$0xff]  ;;  %v1611_v7 = vpack.c.bf16 %v224_v1, %v221_v60  ;;  %v248_v51 = vld [vmem:[#allocation2 + $0x4f8] sm:$0xff] }
  0x85   :  { %v1599_v32 = vpack.c.bf16 %v206_v26, %v203_v21  ;;  %v1715_v6 = vpack.c.bf16 %v607_v63, %v605_v62  ;;  %v613_v21 = vld [vmem:[#allocation5 + $0x40] sm:$0xff]  ;;  %v620_v26 = vld [vmem:[#allocation5 + $0x78] sm:$0xff]  ;;  %v254_v63 = vld [vmem:[#allocation2 + $0x528] sm:$0xff] }
  0x86   :  { %v628_v53 = vld [vmem:[#allocation5 + $0xb8] sm:$0xff]  ;;  %v625_v60 = vld [vmem:[#allocation5 + $0xa0] sm:$0xff] }
  0x87   :  { %1580 = vmatpush1.bf16.msra.mxu0 %v1579_v33  ;;  %1696 = vmatpush3.bf16.msra.mxu1 %v1695_v8  ;;  %v1705_v33 = vpack.c.bf16 %v274_v28, %v271_v27  ;;  %v227_v8 = vld [vmem:[#allocation2 + $0x450] sm:$0xff]  ;;  %v240_v27 = vld [vmem:[#allocation2 + $0x4b8] sm:$0xff] }
  0x88   :  { %1582 = vmatprep.subr.bf16.mxu0 %v1581_v39  ;;  %1698 = vmatprep.subr.bf16.mxu1 %v1697_v11  ;;  %v277_v39 = vld [vmem:[#allocation2 + $0x5e0] sm:$0xff]  ;;  %v611_v11 = vld [vmem:[#allocation5 + $0x30] sm:$0xff]  ;;  %v632_v1 = vld [vmem:[#allocation5 + $0xd8] sm:$0xff] }
  0x89   :  { %v1719_v18 = vpack.c.bf16 %v611_v11, %v609_v10  ;;  %v243_v28 = vld [vmem:[#allocation2 + $0x4d0] sm:$0xff]  ;;  %v260_v11 = vld [vmem:[#allocation2 + $0x558] sm:$0xff] }
  0x8a   :  { %v1621_v35 = vpack.c.bf16 %v243_v28, %v240_v27 }
  0x8b   :  { %1584 = vmatpush1.bf16.msra.mxu0 %v1583_v47  ;;  %v1709_v47 = vpack.c.bf16 %v280_v40, %v277_v39  ;;  %v246_v39 = vld [vmem:[#allocation2 + $0x4e8] sm:$0xff]  ;;  %v249_v40 = vld [vmem:[#allocation2 + $0x500] sm:$0xff] }
  0x8c   :  { %1586 = vmatprep.subr.bf16.mxu0 %v1585_v54  ;;  %v606_v54 = vld [vmem:[#allocation5 + $0x8] sm:$0xff]  ;;  %v1625_v49 = vpack.c.bf16 %v249_v40, %v246_v39 }
  0x8e   :  { %385 = vmatmul.mubr.f32.vlgmr.msra.gmra.mrb[0].mxu0 %v2235_v50  ;;  %v1699_v50 = vpack.c.bf16 %v214_v13, %v211_v12  ;;  %v1613_v12 = vpack.c.bf16 %v231_v5, %v228_v4  ;;  %v230_v13 = vld [vmem:[#allocation2 + $0x468] sm:$0xff] }
  0x8f   :  { %1588 = vmatpush1.bf16.msra.mxu0 %v1587_v61  ;;  %455 = vmatprep.mubr.f32.mxu0 %v2246_v42  ;;  %v209_v42 = vld [vmem:[#allocation2 + $0x3c0] sm:$0xff]  ;;  %v1713_v61 = vpack.c.bf16 %v608_v55, %v606_v54  ;;  %v1615_v19 = vpack.c.bf16 %v230_v13, %v227_v8  ;;  %v252_v54 = vld [vmem:[#allocation2 + $0x518] sm:$0xff]  ;;  %v255_v55 = vld [vmem:[#allocation2 + $0x530] sm:$0xff] }
  0x90   :  { %1590 = vmatprep.subr.bf16.mxu0 %v1589_v2  ;;  %1700 = vmatpush3.bf16.msra.mxu1 %v1699_v50  ;;  %v1603_v45 = vpack.c.bf16 %v212_v38, %v209_v42  ;;  %v610_v2 = vld [vmem:[#allocation5 + $0x28] sm:$0xff]  ;;  %v233_v50 = vld [vmem:[#allocation2 + $0x480] sm:$0xff]  ;;  %v624_v38 = vld [vmem:[#allocation5 + $0x98] sm:$0xff]  ;;  %v1629_v62 = vpack.c.bf16 %v255_v55, %v252_v54 }
  0x91   :  { %1702 = vmatprep.subr.bf16.mxu1 %v1701_v22  ;;  %v615_v22 = vld [vmem:[#allocation5 + $0x50] sm:$0xff]  ;;  %v1619_v30 = vpack.c.bf16 %v236_v24, %v233_v50  ;;  %v617_v42 = vld [vmem:[#allocation5 + $0x60] sm:$0xff]  ;;  %v636_v13 = vld [vmem:[#allocation5 + $0xf8] sm:$0xff] }
  0x92   :  { %v1723_v29 = vpack.c.bf16 %v615_v22, %v613_v21  ;;  %v629_v8 = vld [vmem:[#allocation5 + $0xc0] sm:$0xff]  ;;  %v266_v22 = vld [vmem:[#allocation2 + $0x588] sm:$0xff]  ;;  %v640_v24 = vld [vmem:[#allocation5 + $0x118] sm:$0xff] }
  0x93   :  { %1592 = vmatpush1.bf16.msra.mxu0 %v1591_v9  ;;  %v1717_v9 = vpack.c.bf16 %v612_v3, %v610_v2  ;;  %v258_v2 = vld [vmem:[#allocation2 + $0x548] sm:$0xff]  ;;  %v261_v3 = vld [vmem:[#allocation2 + $0x560] sm:$0xff] }
  0x94   :  { %1594 = vmatprep.subr.bf16.mxu0 %v1593_v14  ;;  %1704 = vmatpush3.bf16.msra.mxu1 %v1703_v31  ;;  %v614_v14 = vld [vmem:[#allocation5 + $0x48] sm:$0xff]  ;;  %v239_v31 = vld [vmem:[#allocation2 + $0x4b0] sm:$0xff]  ;;  %v1633_v10 = vpack.c.bf16 %v261_v3, %v258_v2  ;;  %v633_v50 = vld [vmem:[#allocation5 + $0xe0] sm:$0xff] }
  0x95   :  { %1706 = vmatprep.subr.bf16.mxu1 %v1705_v33  ;;  %v619_v33 = vld [vmem:[#allocation5 + $0x70] sm:$0xff]  ;;  %v1623_v43 = vpack.c.bf16 %v242_v36, %v239_v31  ;;  %v637_v31 = vld [vmem:[#allocation5 + $0x100] sm:$0xff]  ;;  %v644_v36 = vld [vmem:[#allocation5 + $0x138] sm:$0xff] }
  0x96   :  { %v1727_v41 = vpack.c.bf16 %v619_v33, %v617_v42  ;;  %v272_v33 = vld [vmem:[#allocation2 + $0x5b8] sm:$0xff]  ;;  %v645_v55 = vld [vmem:[#allocation5 + $0x140] sm:$0xff] }
  0x97   :  { %1596 = vmatpush1.bf16.msra.mxu0 %v1595_v20  ;;  %v1721_v20 = vpack.c.bf16 %v616_v15, %v614_v14  ;;  %v264_v14 = vld [vmem:[#allocation2 + $0x578] sm:$0xff]  ;;  %v267_v15 = vld [vmem:[#allocation2 + $0x590] sm:$0xff]  ;;  %v653_v3 = vld [vmem:[#allocation5 + $0x180] sm:$0xff] }
  0x98   :  { %1598 = vmatprep.subr.bf16.mxu0 %v1597_v25  ;;  %1708 = vmatpush3.bf16.msra.mxu1 %v1707_v44  ;;  %v618_v25 = vld [vmem:[#allocation5 + $0x68] sm:$0xff]  ;;  %v245_v44 = vld [vmem:[#allocation2 + $0x4e0] sm:$0xff]  ;;  %v1637_v21 = vpack.c.bf16 %v267_v15, %v264_v14  ;;  %v663_v15 = vld [vmem:[#allocation5 + $0x1d0] sm:$0xff] }
  0x99   :  { %1710 = vmatprep.subr.bf16.mxu1 %v1709_v47  ;;  %v623_v47 = vld [vmem:[#allocation5 + $0x90] sm:$0xff]  ;;  %v1627_v57 = vpack.c.bf16 %v248_v51, %v245_v44  ;;  %v641_v44 = vld [vmem:[#allocation5 + $0x120] sm:$0xff]  ;;  %v648_v51 = vld [vmem:[#allocation5 + $0x158] sm:$0xff] }
  0x9a   :  { %v1731_v56 = vpack.c.bf16 %v623_v47, %v621_v46  ;;  %v278_v47 = vld [vmem:[#allocation2 + $0x5e8] sm:$0xff]  ;;  %v661_v14 = vld [vmem:[#allocation5 + $0x1c0] sm:$0xff] }
  0x9b   :  { %1600 = vmatpush1.bf16.msra.mxu0 %v1599_v32  ;;  %v1725_v32 = vpack.c.bf16 %v620_v26, %v618_v25  ;;  %v270_v25 = vld [vmem:[#allocation2 + $0x5a8] sm:$0xff]  ;;  %v273_v26 = vld [vmem:[#allocation2 + $0x5c0] sm:$0xff] }
  0x9c   :  { %1602 = vmatprep.subr.bf16.mxu0 %v1601_v37  ;;  %1712 = vmatpush3.bf16.msra.mxu1 %v1711_v58  ;;  %v622_v37 = vld [vmem:[#allocation5 + $0x88] sm:$0xff]  ;;  %v251_v58 = vld [vmem:[#allocation2 + $0x510] sm:$0xff]  ;;  %v1641_v42 = vpack.c.bf16 %v273_v26, %v270_v25  ;;  %v861_v26 = vld [vmem:[#allocation7 + $0x20] sm:$0xff] }
  0x9d   :  { %1714 = vmatprep.subr.bf16.mxu1 %v1713_v61  ;;  %v627_v61 = vld [vmem:[#allocation5 + $0xb0] sm:$0xff]  ;;  %v1631_v5 = vpack.c.bf16 %v254_v63, %v251_v58  ;;  %v652_v58 = vld [vmem:[#allocation5 + $0x178] sm:$0xff]  ;;  %v654_v63 = vld [vmem:[#allocation5 + $0x188] sm:$0xff] }
  0x9e   :  { %v1735_v4 = vpack.c.bf16 %v627_v61, %v625_v60  ;;  %v649_v61 = vld [vmem:[#allocation5 + $0x160] sm:$0xff]  ;;  %v858_v25 = vld [vmem:[#allocation7 + $0x8] sm:$0xff] }
  0x9f   :  { %1604 = vmatpush1.bf16.msra.mxu0 %v1603_v45  ;;  %597 = vmatmul.mubr.f32.vlgmr.msra.gmra.mrb[2].mxu1 %v2242_v48  ;;  %v1729_v45 = vpack.c.bf16 %v624_v38, %v622_v37  ;;  %v276_v37 = vld [vmem:[#allocation2 + $0x5d8] sm:$0xff]  ;;  %v279_v38 = vld [vmem:[#allocation2 + $0x5f0] sm:$0xff] }
  0xa0   :  { %1606 = vmatprep.subr.bf16.mxu0 %v1605_v52  ;;  %1716 = vmatpush1.bf16.msra.mxu1 %v1715_v6  ;;  %v626_v52 = vld [vmem:[#allocation5 + $0xa8] sm:$0xff]  ;;  %v257_v6 = vld [vmem:[#allocation2 + $0x540] sm:$0xff]  ;;  %v1645_v46 = vpack.c.bf16 %v279_v38, %v276_v37 }
  0xa1   :  { %1718 = vmatprep.subr.bf16.mxu1 %v1717_v9  ;;  %v631_v9 = vld [vmem:[#allocation5 + $0xd0] sm:$0xff]  ;;  %v1635_v17 = vpack.c.bf16 %v260_v11, %v257_v6  ;;  %v660_v6 = vld [vmem:[#allocation5 + $0x1b8] sm:$0xff]  ;;  %v873_v37 = vld [vmem:[#allocation7 + $0x80] sm:$0xff] }
  0xa2   :  { %v1739_v16 = vpack.c.bf16 %v631_v9, %v629_v8  ;;  %v657_v9 = vld [vmem:[#allocation5 + $0x1a0] sm:$0xff] }
  0xa3   :  { %1608 = vmatpush1.bf16.msra.mxu0 %v1607_v59  ;;  %v1733_v59 = vpack.c.bf16 %v628_v53, %v626_v52 }
  0xa4   :  { %1610 = vmatprep.subr.bf16.mxu0 %v1609_v0  ;;  %1720 = vmatpush1.bf16.msra.mxu1 %v1719_v18  ;;  %v630_v0 = vld [vmem:[#allocation5 + $0xc8] sm:$0xff]  ;;  %v263_v18 = vld [vmem:[#allocation2 + $0x570] sm:$0xff] }
  0xa5   :  { %1722 = vmatprep.subr.bf16.mxu1 %v1721_v20  ;;  %v635_v20 = vld [vmem:[#allocation5 + $0xf0] sm:$0xff]  ;;  %v1639_v28 = vpack.c.bf16 %v266_v22, %v263_v18  ;;  %v668_v18 = vld [vmem:[#allocation5 + $0x1f8] sm:$0xff]  ;;  %v670_v22 = vld [vmem:[#allocation5 + $0x208] sm:$0xff] }
  0xa6   :  { %v1743_v27 = vpack.c.bf16 %v635_v20, %v633_v50  ;;  %v665_v50 = vld [vmem:[#allocation5 + $0x1e0] sm:$0xff]  ;;  %v667_v20 = vld [vmem:[#allocation5 + $0x1f0] sm:$0xff] }
  0xa7   :  { %1612 = vmatpush1.bf16.msra.mxu0 %v1611_v7  ;;  %v1737_v7 = vpack.c.bf16 %v632_v1, %v630_v0  ;;  %v656_v0 = vld [vmem:[#allocation5 + $0x198] sm:$0xff] }
  0xa8   :  { %1614 = vmatprep.subr.bf16.mxu0 %v1613_v12  ;;  %1724 = vmatpush1.bf16.msra.mxu1 %v1723_v29  ;;  %v634_v12 = vld [vmem:[#allocation5 + $0xe8] sm:$0xff]  ;;  %v269_v29 = vld [vmem:[#allocation2 + $0x5a0] sm:$0xff]  ;;  %v1761_v2 = vpack.c.bf16 %v656_v0, %v654_v63  ;;  %v887_v63 = vld [vmem:[#allocation7 + $0xf0] sm:$0xff] }
  0xa9   :  { %1726 = vmatprep.subr.bf16.mxu1 %v1725_v32  ;;  %v639_v32 = vld [vmem:[#allocation5 + $0x110] sm:$0xff]  ;;  %v1643_v40 = vpack.c.bf16 %v272_v33, %v269_v29  ;;  %v860_v29 = vld [vmem:[#allocation7 + $0x18] sm:$0xff]  ;;  %v890_v0 = vld [vmem:[#allocation7 + $0x108] sm:$0xff] }
  0xaa   :  { %v1747_v39 = vpack.c.bf16 %v639_v32, %v637_v31  ;;  %v867_v31 = vld [vmem:[#allocation7 + $0x50] sm:$0xff] }
  0xab   :  { %1616 = vmatpush1.bf16.msra.mxu0 %v1615_v19  ;;  %v1741_v19 = vpack.c.bf16 %v636_v13, %v634_v12  ;;  %v662_v12 = vld [vmem:[#allocation5 + $0x1c8] sm:$0xff]  ;;  %v664_v13 = vld [vmem:[#allocation5 + $0x1d8] sm:$0xff]  ;;  %v863_v33 = vld [vmem:[#allocation7 + $0x30] sm:$0xff] }
  0xac   :  { %1618 = vmatprep.subr.bf16.mxu0 %v1617_v23  ;;  %1728 = vmatpush1.bf16.msra.mxu1 %v1727_v41  ;;  %v638_v23 = vld [vmem:[#allocation5 + $0x108] sm:$0xff]  ;;  %v275_v41 = vld [vmem:[#allocation2 + $0x5d0] sm:$0xff] }
  0xad   :  { %1730 = vmatprep.subr.bf16.mxu1 %v1729_v45  ;;  %v643_v45 = vld [vmem:[#allocation5 + $0x130] sm:$0xff]  ;;  %v1647_v53 = vpack.c.bf16 %v278_v47, %v275_v41  ;;  %v872_v41 = vld [vmem:[#allocation7 + $0x78] sm:$0xff] }
  0xae   :  { %v1751_v52 = vpack.c.bf16 %v643_v45, %v641_v44  ;;  %v879_v44 = vld [vmem:[#allocation7 + $0xb0] sm:$0xff] }
  0xaf   :  { %1620 = vmatpush1.bf16.msra.mxu0 %v1619_v30  ;;  %v1745_v30 = vpack.c.bf16 %v640_v24, %v638_v23  ;;  %v672_v23 = vld [vmem:[#allocation5 + $0x218] sm:$0xff]  ;;  %v875_v47 = vld [vmem:[#allocation7 + $0x90] sm:$0xff] }
  0xb0   :  { %1622 = vmatprep.subr.bf16.mxu0 %v1621_v35  ;;  %1732 = vmatpush1.bf16.msra.mxu1 %v1731_v56  ;;  %v642_v35 = vld [vmem:[#allocation5 + $0x128] sm:$0xff]  ;;  %v647_v56 = vld [vmem:[#allocation5 + $0x150] sm:$0xff]  ;;  %v1777_v24 = vpack.c.bf16 %v672_v23, %v670_v22 }
  0xb1   :  { %1734 = vmatprep.subr.bf16.mxu1 %v1733_v59  ;;  %v1755_v59 = vpack.c.bf16 %v647_v56, %v645_v55  ;;  %v881_v55 = vld [vmem:[#allocation7 + $0xc0] sm:$0xff]  ;;  %v884_v56 = vld [vmem:[#allocation7 + $0xd8] sm:$0xff]  ;;  %v911_v22 = vld [vmem:[#allocation7 + $0x1b0] sm:$0xff] }
  0xb2   :  { %v914_v23 = vld [vmem:[#allocation7 + $0x1c8] sm:$0xff] }
  0xb3   :  { %1624 = vmatpush1.bf16.msra.mxu0 %v1623_v43  ;;  %v1749_v43 = vpack.c.bf16 %v644_v36, %v642_v35  ;;  %v866_v35 = vld [vmem:[#allocation7 + $0x48] sm:$0xff] }
  0xb4   :  { %1626 = vmatprep.subr.bf16.mxu0 %v1625_v49  ;;  %1736 = vmatpush1.bf16.msra.mxu1 %v1735_v4  ;;  %v646_v49 = vld [vmem:[#allocation5 + $0x148] sm:$0xff]  ;;  %v655_v4 = vld [vmem:[#allocation5 + $0x190] sm:$0xff]  ;;  %v1815_v38 = vpack.c.bf16 %v866_v35, %v863_v33  ;;  %v281_v33 = vld [vmem:[%s2310_s2] sm:$0x7] }
  0xb5   :  { %1738 = vmatprep.subr.bf16.mxu1 %v1737_v7  ;;  %v1753_v54 = vpack.c.bf16 %v648_v51, %v646_v49  ;;  %v1763_v7 = vpack.c.bf16 %v655_v4, %v653_v3  ;;  %v870_v36 = vld [vmem:[#allocation7 + $0x68] sm:$0xff]  ;;  %v897_v3 = vld [vmem:[#allocation7 + $0x140] sm:$0xff]  ;;  %v1831_v4 = vpack.c.bf16 %v890_v0, %v887_v63  ;;  %v2263_v63 = vsub.s32 0, %v2223_v34 }
  0xb6   :  { %v878_v49 = vld [vmem:[#allocation7 + $0xa8] sm:$0xff]  ;;  %v2266_v0 = vsub.s32 1, %v2223_v34 }
  0xb7   :  { %1628 = vmatpush1.bf16.msra.mxu0 %v1627_v57  ;;  %v650_v57 = vld [vmem:[#allocation5 + $0x168] sm:$0xff] }
  0xb8   :  { %1630 = vmatprep.subr.bf16.mxu0 %v1629_v62  ;;  %1740 = vmatpush1.bf16.msra.mxu1 %v1739_v16  ;;  %v1757_v60 = vpack.c.bf16 %v652_v58, %v650_v57  ;;  %v651_v62 = vld [vmem:[#allocation5 + $0x170] sm:$0xff]  ;;  %v1771_v16 = vpack.c.bf16 %v663_v15, %v661_v14  ;;  %v882_v51 = vld [vmem:[#allocation7 + $0xc8] sm:$0xff]  ;;  %v888_v57 = vld [vmem:[#allocation7 + $0xf8] sm:$0xff] }
  0xb9   :  { %1742 = vmatprep.subr.bf16.mxu1 %v1741_v19  ;;  %v1759_v1 = vpack.c.bf16 %v651_v62, %v649_v61  ;;  %v891_v58 = vld [vmem:[#allocation7 + $0x110] sm:$0xff]  ;;  %v909_v14 = vld [vmem:[#allocation7 + $0x1a0] sm:$0xff] }
  0xba   :  { %v1829_v62 = vpack.c.bf16 %v891_v58, %v888_v57  ;;  %v942_v58 = vld [vmem:[#allocation7 + $0x2a8] sm:$0xff] }
  0xbb   :  { %1632 = vmatpush1.bf16.msra.mxu0 %v1631_v5  ;;  %v658_v5 = vld [vmem:[#allocation5 + $0x1a8] sm:$0xff] }
  0xbc   :  { %1634 = vmatprep.subr.bf16.mxu0 %v1633_v10  ;;  %1744 = vmatpush1.bf16.msra.mxu1 %v1743_v27  ;;  %v1765_v8 = vpack.c.bf16 %v660_v6, %v658_v5  ;;  %v659_v10 = vld [vmem:[#allocation5 + $0x1b0] sm:$0xff]  ;;  %v857_v27 = vld [vmem:[#allocation7] sm:$0xff] }
  0xbd   :  { %1746 = vmatprep.subr.bf16.mxu1 %v1745_v30  ;;  %v1767_v11 = vpack.c.bf16 %v659_v10, %v657_v9  ;;  %v864_v30 = vld [vmem:[#allocation7 + $0x38] sm:$0xff]  ;;  %v1811_v32 = vpack.c.bf16 %v860_v29, %v857_v27  ;;  %v893_v6 = vld [vmem:[#allocation7 + $0x120] sm:$0xff]  ;;  %v903_v9 = vld [vmem:[#allocation7 + $0x170] sm:$0xff] }
  0xbe   :  { %v920_v29 = vld [vmem:[#allocation7 + $0x1f8] sm:$0xff] }
  0xbf   :  { %1636 = vmatpush1.bf16.msra.mxu0 %v1635_v17  ;;  %v666_v17 = vld [vmem:[#allocation5 + $0x1e8] sm:$0xff] }
  0xc0   :  { %1638 = vmatprep.subr.bf16.mxu0 %v1637_v21  ;;  %1748 = vmatpush1.bf16.msra.mxu1 %v1747_v39  ;;  %v1773_v19 = vpack.c.bf16 %v668_v18, %v666_v17  ;;  %v1775_v21 = vpack.c.bf16 %v667_v20, %v665_v50  ;;  %v1817_v39 = vpack.c.bf16 %v873_v37, %v870_v36  ;;  %v905_v17 = vld [vmem:[#allocation7 + $0x180] sm:$0xff]  ;;  %v908_v18 = vld [vmem:[#allocation7 + $0x198] sm:$0xff]  ;;  %v915_v50 = vld [vmem:[#allocation7 + $0x1d0] sm:$0xff] }
  0xc1   :  { %1750 = vmatprep.subr.bf16.mxu1 %v1749_v43  ;;  %v876_v43 = vld [vmem:[#allocation7 + $0x98] sm:$0xff]  ;;  %v1843_v20 = vpack.c.bf16 %v908_v18, %v905_v17  ;;  %v923_v36 = vld [vmem:[#allocation7 + $0x210] sm:$0xff]  ;;  %v926_v37 = vld [vmem:[#allocation7 + $0x228] sm:$0xff] }
  0xc2   :  { %v680_v17 = vld [vmem:[#allocation5 + $0x258] sm:$0xff] }
  0xc3   :  { %1640 = vmatpush1.bf16.msra.mxu0 %v1639_v28  ;;  %v1809_v28 = vpack.c.bf16 %v861_v26, %v858_v25  ;;  %v921_v25 = vld [vmem:[#allocation7 + $0x200] sm:$0xff]  ;;  %v1847_v26 = vpack.c.bf16 %v914_v23, %v911_v22  ;;  %v682_v22 = vld [vmem:[#allocation5 + $0x268] sm:$0xff]  ;;  %v684_v23 = vld [vmem:[#allocation5 + $0x278] sm:$0xff] }
  0xc4   :  { %1642 = vmatprep.subr.bf16.mxu0 %v1641_v42  ;;  %1752 = vmatpush1.bf16.msra.mxu1 %v1751_v52  ;;  %v1813_v42 = vpack.c.bf16 %v867_v31, %v864_v30  ;;  %v885_v52 = vld [vmem:[#allocation7 + $0xe0] sm:$0xff]  ;;  %v924_v30 = vld [vmem:[#allocation7 + $0x218] sm:$0xff]  ;;  %v927_v31 = vld [vmem:[#allocation7 + $0x230] sm:$0xff] }
  0xc5   :  { %1754 = vmatprep.subr.bf16.mxu1 %v1753_v54  ;;  %v1825_v54 = vpack.c.bf16 %v885_v52, %v882_v51  ;;  %v1853_v35 = vpack.c.bf16 %v927_v31, %v924_v30 }
  0xc7   :  { %1644 = vmatpush1.bf16.msra.mxu0 %v1643_v40  ;;  %v869_v40 = vld [vmem:[#allocation7 + $0x60] sm:$0xff] }
  0xc8   :  { %1646 = vmatprep.subr.bf16.mxu0 %v1645_v46  ;;  %1756 = vmatpush1.bf16.msra.mxu1 %v1755_v59  ;;  %v1819_v45 = vpack.c.bf16 %v872_v41, %v869_v40  ;;  %v1821_v46 = vpack.c.bf16 %v879_v44, %v876_v43  ;;  %v1855_v41 = vpack.c.bf16 %v926_v37, %v923_v36  ;;  %v929_v44 = vld [vmem:[#allocation7 + $0x240] sm:$0xff]  ;;  %v692_v36 = vld [vmem:[#allocation5 + $0x2b8] sm:$0xff] }
  0xc9   :  { %1758 = vmatprep.subr.bf16.mxu1 %v1757_v60  ;;  %v1827_v60 = vpack.c.bf16 %v884_v56, %v881_v55  ;;  %v935_v55 = vld [vmem:[#allocation7 + $0x270] sm:$0xff]  ;;  %v938_v56 = vld [vmem:[#allocation7 + $0x288] sm:$0xff] }
  0xcb   :  { %1648 = vmatpush1.bf16.msra.mxu0 %v1647_v53  ;;  %v1823_v53 = vpack.c.bf16 %v878_v49, %v875_v47  ;;  %v939_v47 = vld [vmem:[#allocation7 + $0x290] sm:$0xff] }
  0xcc   :  { %1760 = vmatpush1.bf16.msra.mxu1 %v1759_v1  ;;  %1810 = vmatprep.subr.bf16.mxu0 %v1809_v28  ;;  %v917_v28 = vld [vmem:[#allocation7 + $0x1e0] sm:$0xff] }
  0xcd   :  { %1762 = vmatprep.subr.bf16.mxu1 %v1761_v2  ;;  %v894_v2 = vld [vmem:[#allocation7 + $0x128] sm:$0xff] }
  0xce   :  { %456 = vmatmul.mubr.f32.vlgmr.msra.gmra.mrb[0].mxu0 %v2242_v48  ;;  %v1769_v48 = vpack.c.bf16 %v664_v13, %v662_v12  ;;  %v1833_v5 = vpack.c.bf16 %v897_v3, %v894_v2  ;;  %v899_v12 = vld [vmem:[#allocation7 + $0x150] sm:$0xff]  ;;  %v902_v13 = vld [vmem:[#allocation7 + $0x168] sm:$0xff]  ;;  %v290_v2 = vrot.slane %v281_v33, %v2266_v0 }
  0xcf   :  { %1812 = vmatpush1.bf16.msra.mxu0 %v1811_v32  ;;  %v1839_v15 = vpack.c.bf16 %v902_v13, %v899_v12  ;;  %v293_v32 = vsub.s32 2, %v2223_v34 }
  0xd0   :  { %1764 = vmatpush1.bf16.msra.mxu1 %v1763_v7  ;;  %1814 = vmatprep.subr.bf16.mxu0 %v1813_v42  ;;  %v896_v7 = vld [vmem:[#allocation7 + $0x138] sm:$0xff]  ;;  %v1851_v42 = vpack.c.bf16 %v920_v29, %v917_v28  ;;  %v686_v28 = vld [vmem:[#allocation5 + $0x288] sm:$0xff] }
  0xd1   :  { %1766 = vmatprep.subr.bf16.mxu1 %v1765_v8  ;;  %v900_v8 = vld [vmem:[#allocation7 + $0x158] sm:$0xff]  ;;  %v1835_v10 = vpack.c.bf16 %v896_v7, %v893_v6  ;;  %v294_v40 = vrot.slane %v281_v33, %v293_v32  ;;  %v669_v6 = vld [vmem:[#allocation5 + $0x200] sm:$0xff]  ;;  %v671_v7 = vld [vmem:[#allocation5 + $0x210] sm:$0xff] }
  0xd2   :  { %v1779_v12 = vpack.c.bf16 %v671_v7, %v669_v6  ;;  %v688_v29 = vld [vmem:[#allocation5 + $0x298] sm:$0xff]  ;;  %v865_v6 = vld [vmem:[#allocation7 + $0x40] sm:$0xff] }
  0xd3   :  { %1816 = vmatpush1.bf16.msra.mxu0 %v1815_v38  ;;  %v930_v38 = vld [vmem:[#allocation7 + $0x248] sm:$0xff]  ;;  %v1793_v31 = vpack.c.bf16 %v688_v29, %v686_v28  ;;  %v868_v7 = vld [vmem:[#allocation7 + $0x58] sm:$0xff]  ;;  %v889_v28 = vld [vmem:[#allocation7 + $0x100] sm:$0xff] }
  0xd4   :  { %1768 = vmatpush1.bf16.msra.mxu1 %v1767_v11  ;;  %1818 = vmatprep.subr.bf16.mxu0 %v1817_v39  ;;  %v1837_v11 = vpack.c.bf16 %v903_v9, %v900_v8  ;;  %v933_v39 = vld [vmem:[#allocation7 + $0x260] sm:$0xff]  ;;  %v674_v9 = vld [vmem:[#allocation5 + $0x228] sm:$0xff]  ;;  %v892_v29 = vld [vmem:[#allocation7 + $0x118] sm:$0xff] }
  0xd5   :  { %1770 = vmatprep.subr.bf16.mxu1 %v1769_v48  ;;  %v906_v48 = vld [vmem:[#allocation7 + $0x188] sm:$0xff]  ;;  %v1857_v43 = vpack.c.bf16 %v933_v39, %v930_v38  ;;  %v689_v39 = vld [vmem:[#allocation5 + $0x2a0] sm:$0xff] }
  0xd7   :  { %1820 = vmatpush1.bf16.msra.mxu0 %v1819_v45  ;;  %v932_v45 = vld [vmem:[#allocation7 + $0x258] sm:$0xff] }
  0xd8   :  { %1772 = vmatpush1.bf16.msra.mxu1 %v1771_v16  ;;  %1822 = vmatprep.subr.bf16.mxu0 %v1821_v46  ;;  %v1841_v16 = vpack.c.bf16 %v909_v14, %v906_v48  ;;  %v936_v46 = vld [vmem:[#allocation7 + $0x278] sm:$0xff]  ;;  %v1859_v52 = vpack.c.bf16 %v932_v45, %v929_v44  ;;  %v673_v14 = vld [vmem:[#allocation5 + $0x220] sm:$0xff] }
  0xd9   :  { %1774 = vmatprep.subr.bf16.mxu1 %v1773_v19  ;;  %v912_v19 = vld [vmem:[#allocation7 + $0x1b8] sm:$0xff] }
  0xdb   :  { %1824 = vmatpush1.bf16.msra.mxu0 %v1823_v53 }
  0xdc   :  { %1776 = vmatpush1.bf16.msra.mxu1 %v1775_v21  ;;  %1826 = vmatprep.subr.bf16.mxu0 %v1825_v54  ;;  %v1845_v21 = vpack.c.bf16 %v915_v50, %v912_v19  ;;  %v1861_v54 = vpack.c.bf16 %v939_v47, %v936_v46  ;;  %v2114_v19 = vmov 0.0   ;;  %v693_v46 = vld [vmem:[#allocation5 + $0x2c0] sm:$0xff]  ;;  %v695_v47 = vld [vmem:[#allocation5 + $0x2d0] sm:$0xff] }
  0xdd   :  { %1778 = vmatprep.subr.bf16.mxu1 %v1777_v24  ;;  %v918_v24 = vld [vmem:[#allocation7 + $0x1e8] sm:$0xff] }
  0xde   :  { %v1849_v27 = vpack.c.bf16 %v921_v25, %v918_v24  ;;  %v1789_v25 = vpack.c.bf16 %v684_v23, %v682_v22  ;;  %v883_v22 = vld [vmem:[#allocation7 + $0xd0] sm:$0xff]  ;;  %v886_v23 = vld [vmem:[#allocation7 + $0xe8] sm:$0xff] }
  0xdf   :  { %1828 = vmatpush1.bf16.msra.mxu0 %v1827_v60 }
  0xe0   :  { %1830 = vmatprep.subr.bf16.mxu0 %v1829_v62 }
  0xe3   :  { %1832 = vmatpush1.bf16.msra.mxu0 %v1831_v4 }
  0xe4   :  { %1834 = vmatprep.subr.bf16.mxu0 %v1833_v5 }
  0xe7   :  { %1836 = vmatpush1.bf16.msra.mxu0 %v1835_v10  ;;  %v676_v10 = vld [vmem:[#allocation5 + $0x238] sm:$0xff] }
  0xe8   :  { %1838 = vmatprep.subr.bf16.mxu0 %v1837_v11  ;;  %v1781_v48 = vpack.c.bf16 %v676_v10, %v674_v9  ;;  %v922_v9 = vld [vmem:[#allocation7 + $0x208] sm:$0xff]  ;;  %v1879_v10 = vpack.c.bf16 %v868_v7, %v865_v6  ;;  %v1146_v7 = vld [vmem:[#allocation8 + $0x100] sm:$0xff] }
  0xe9   :  { %v1115_v6 = vld [vmem:[#allocation8 + $0x8] sm:$0xff] }
  0xeb   :  { %1840 = vmatpush1.bf16.msra.mxu0 %v1839_v15  ;;  %v675_v15 = vld [vmem:[#allocation5 + $0x230] sm:$0xff] }
  0xec   :  { %1842 = vmatprep.subr.bf16.mxu0 %v1841_v16  ;;  %v678_v16 = vld [vmem:[#allocation5 + $0x248] sm:$0xff]  ;;  %v1783_v18 = vpack.c.bf16 %v675_v15, %v673_v14  ;;  %v928_v14 = vld [vmem:[#allocation7 + $0x238] sm:$0xff] }
  0xed   :  { %v1785_v50 = vpack.c.bf16 %v680_v17, %v678_v16  ;;  %v880_v17 = vld [vmem:[#allocation7 + $0xb8] sm:$0xff] }
  0xef   :  { %1844 = vmatpush1.bf16.msra.mxu0 %v1843_v20  ;;  %v677_v20 = vld [vmem:[#allocation5 + $0x240] sm:$0xff] }
  0xf0   :  { %1846 = vmatprep.subr.bf16.mxu0 %v1845_v21  ;;  %v679_v21 = vld [vmem:[#allocation5 + $0x250] sm:$0xff] }
  0xf1   :  { %v1787_v24 = vpack.c.bf16 %v679_v21, %v677_v20 }
  0xf3   :  { %1848 = vmatpush1.bf16.msra.mxu0 %v1847_v26  ;;  %v681_v26 = vld [vmem:[#allocation5 + $0x260] sm:$0xff] }
  0xf4   :  { %1850 = vmatprep.subr.bf16.mxu0 %v1849_v27  ;;  %v683_v27 = vld [vmem:[#allocation5 + $0x270] sm:$0xff] }
  0xf5   :  { %v1791_v30 = vpack.c.bf16 %v683_v27, %v681_v26  ;;  %v1891_v26 = vpack.c.bf16 %v886_v23, %v883_v22  ;;  %v1118_v23 = vld [vmem:[#allocation8 + $0x20] sm:$0xff] }
  0xf7   :  { %1852 = vmatpush1.bf16.msra.mxu0 %v1851_v42  ;;  %v685_v42 = vld [vmem:[#allocation5 + $0x280] sm:$0xff] }
  0xf8   :  { %1854 = vmatprep.subr.bf16.mxu0 %v1853_v35  ;;  %v690_v35 = vld [vmem:[#allocation5 + $0x2a8] sm:$0xff] }
  0xf9   :  { %v1797_v38 = vpack.c.bf16 %v692_v36, %v690_v35  ;;  %v941_v35 = vld [vmem:[#allocation7 + $0x2a0] sm:$0xff]  ;;  %v944_v36 = vld [vmem:[#allocation7 + $0x2b8] sm:$0xff] }
  0xfb   :  { %1856 = vmatpush1.bf16.msra.mxu0 %v1855_v41  ;;  %v694_v41 = vld [vmem:[#allocation5 + $0x2c8] sm:$0xff] }
  0xfc   :  { %1858 = vmatprep.subr.bf16.mxu0 %v1857_v43  ;;  %v696_v43 = vld [vmem:[#allocation5 + $0x2d8] sm:$0xff] }
  0xfd   :  { %v1801_v45 = vpack.c.bf16 %v696_v43, %v694_v41  ;;  %v948_v41 = vld [vmem:[#allocation7 + $0x2d8] sm:$0xff]  ;;  %v951_v43 = vld [vmem:[#allocation7 + $0x2f0] sm:$0xff] }
  0xff   :  { %1860 = vmatpush1.bf16.msra.mxu0 %v1859_v52  ;;  %v1803_v52 = vpack.c.bf16 %v695_v47, %v693_v46  ;;  %v952_v46 = vld [vmem:[#allocation7 + $0x2f8] sm:$0xff]  ;;  %v947_v47 = vld [vmem:[#allocation7 + $0x2d0] sm:$0xff] }
 0x100   :  { %1862 = vmatprep.subr.bf16.mxu0 %v1861_v54  ;;  %v697_v54 = vld [vmem:[#allocation5 + $0x2e0] sm:$0xff] }
 0x14d   :  { %v1361_v59 = vpop.f32.mrb[0].mxu1 }
 0x14e   :  { %v1362_v61 = vpop.f32.mrb[1].mxu1 }
 0x14f   :  { %v1363_v1 = vadd.f32 %v1362_v61, %v1361_v59  ;;  %v945_v59 = vld [vmem:[#allocation7 + $0x2c0] sm:$0xff]  ;;  %v1863_v61 = vpack.c.bf16 %v938_v56, %v935_v55  ;;  %v699_v55 = vld [vmem:[#allocation5 + $0x2f0] sm:$0xff] }
 0x150   :  { %v1865_v62 = vpack.c.bf16 %v945_v59, %v942_v58  ;;  %v907_v56 = vld [vmem:[#allocation7 + $0x190] sm:$0xff]  ;;  %v1807_v58 = vpack.c.bf16 %v699_v55, %v697_v54  ;;  %v904_v54 = vld [vmem:[#allocation7 + $0x178] sm:$0xff] }
 0x151   :  { %v529_v49 = vadd.f32 %v1363_v1, %v294_v40  ;;  %1864 = vmatpush1.bf16.msra.mxu0 %v1863_v61  ;;  %v286_v1 = vrot.slane %v281_v33, %v2263_v63  ;;  %v687_v33 = vld [vmem:[#allocation5 + $0x290] sm:$0xff] }
 0x152   :  { %1866 = vmatprep.subr.bf16.mxu0 %v1865_v62  ;;  %v1795_v37 = vpack.c.bf16 %v687_v33, %v685_v42  ;;  %v691_v40 = vld [vmem:[#allocation5 + $0x2b0] sm:$0xff]  ;;  %v862_v62 = vld [vmem:[#allocation7 + $0x28] sm:$0xff]  ;;  %v1895_v42 = vpack.c.bf16 %v892_v29, %v889_v28  ;;  %v1137_v29 = vld [vmem:[#allocation8 + $0xb8] sm:$0xff] }
 0x153   :  { %v1799_v44 = vpack.c.bf16 %v691_v40, %v689_v39  ;;  %v859_v61 = vld [vmem:[#allocation7 + $0x10] sm:$0xff]  ;;  %v898_v39 = vld [vmem:[#allocation7 + $0x148] sm:$0xff] }
 0x154   :  { %v1136_v28 = vld [vmem:[#allocation8 + $0xb0] sm:$0xff] }
 0x172   :  { %v1396_v51 = vpop.f32.mrb[2].mxu1 }
 0x173   :  { %v1397_v53 = vpop.f32.mrb[3].mxu1 }
 0x174   :  { %v1398_v57 = vadd.f32 %v1397_v53, %v1396_v51  ;;  %v700_v51 = vld [vmem:[#allocation5 + $0x2f8] sm:$0xff] }
 0x176   :  { %v2260_v60 = vadd.f32 %v1398_v57, %v529_v49  ;;  %v698_v49 = vld [vmem:[#allocation5 + $0x2e8] sm:$0xff] }
 0x177   :  { %v1805_v53 = vpack.c.bf16 %v700_v51, %v698_v49  ;;  %v910_v57 = vld [vmem:[#allocation7 + $0x1a8] sm:$0xff] }
 0x178   :  { %v1873_v59 = vpack.c.bf16 %v910_v57, %v907_v56  ;;  %v950_v49 = vld [vmem:[#allocation7 + $0x2e8] sm:$0xff]  ;;  %v1130_v56 = vld [vmem:[#allocation8 + $0x80] sm:$0xff] }
 0x179   :  { %v1131_v57 = vld [vmem:[#allocation8 + $0x88] sm:$0xff] }
 0x1a1   :  { %v457_v3 = vpop.f32.mrb[0].mxu0 }
 0x1a2   :  { %v1961_v4 = vadd.f32 %v457_v3, %v286_v1  ;;  %v459_v5 = vpop.f32.mrb[1].mxu0  ;;  %v913_v1 = vld [vmem:[#allocation7 + $0x1c0] sm:$0xff]  ;;  %v1875_v3 = vpack.c.bf16 %v862_v62, %v859_v61 }
 0x1a3   :  { %v1962_v8 = vadd.f32 %v459_v5, %v290_v2  ;;  %v916_v2 = vld [vmem:[#allocation7 + $0x1d8] sm:$0xff]  ;;  %v701_v61 = vld [vmem:[%s2312_s4] sm:$0x3] }
 0x1a4   :  { %v602_v13 = vmax.f32 %v1961_v4, 0.0  ;;  %v604_v4 = vmax.f32 %v2260_v60, 0.0  ;;  %v1877_v5 = vpack.c.bf16 %v916_v2, %v913_v1  ;;  %v877_v60 = vld [vmem:[#allocation7 + $0xa0] sm:$0xff]  ;;  %v706_v62 = vrot.slane %v701_v61, %v2263_v63 }
 0x1a5   :  { %v603_v11 = vmax.f32 %v1962_v8, 0.0  ;;  %v919_v8 = vld [vmem:[#allocation7 + $0x1f0] sm:$0xff]  ;;  %v1887_v20 = vpack.c.bf16 %v880_v17, %v877_v60  ;;  %v710_v1 = vrot.slane %v701_v61, %v2266_v0  ;;  %v1117_v60 = vld [vmem:[#allocation8 + $0x18] sm:$0xff]  ;;  %v1142_v61 = vld [vmem:[#allocation8 + $0xe0] sm:$0xff] }
 0x1a6   :  { %v1148_v17 = vld [vmem:[#allocation8 + $0x110] sm:$0xff] }
 0x1a7   :  { %777 = vmatprep.mubr.f32.mxu1 %v603_v11  ;;  %v1881_v11 = vpack.c.bf16 %v922_v9, %v919_v8  ;;  %v1147_v8 = vld [vmem:[#allocation8 + $0x108] sm:$0xff] }
 0x1a8   :  { %778 = vmatmul.mubr.f32.vlgmr.msra.gmra.mrb[4].mxu1 %v602_v13  ;;  %v874_v13 = vld [vmem:[#allocation7 + $0x88] sm:$0xff] }
 0x1a9   :  { %1780 = vmatpush1.bf16.msra.mxu1 %v1779_v12  ;;  %848 = vmatprep.mubr.f32.mxu1 %v2114_v19  ;;  %v871_v12 = vld [vmem:[#allocation7 + $0x70] sm:$0xff] }
 0x1aa   :  { %1782 = vmatprep.subr.bf16.mxu1 %v1781_v48  ;;  %v925_v48 = vld [vmem:[#allocation7 + $0x220] sm:$0xff]  ;;  %v1883_v15 = vpack.c.bf16 %v874_v13, %v871_v12 }
 0x1ab   :  { %v1885_v16 = vpack.c.bf16 %v928_v14, %v925_v48  ;;  %v1938_v48 = vpack.c.bf16 %v1147_v8, %v1146_v7  ;;  %v1116_v14 = vld [vmem:[#allocation8 + $0x10] sm:$0xff]  ;;  %v1158_v7 = vld [vmem:[#allocation8 + $0x160] sm:$0xff]  ;;  %v1159_v8 = vld [vmem:[#allocation8 + $0x168] sm:$0xff] }
 0x1ad   :  { %1784 = vmatpush1.bf16.msra.mxu1 %v1783_v18  ;;  %v931_v18 = vld [vmem:[#allocation7 + $0x250] sm:$0xff] }
 0x1ae   :  { %1786 = vmatprep.subr.bf16.mxu1 %v1785_v50  ;;  %v934_v50 = vld [vmem:[#allocation7 + $0x268] sm:$0xff] }
 0x1af   :  { %v1889_v21 = vpack.c.bf16 %v934_v50, %v931_v18  ;;  %v1149_v18 = vld [vmem:[#allocation8 + $0x118] sm:$0xff]  ;;  %v1134_v50 = vld [vmem:[#allocation8 + $0xa0] sm:$0xff] }
 0x1b0   :  { %v1941_v22 = vpack.c.bf16 %v1149_v18, %v1148_v17  ;;  %v953_v17 = vld [vmem:[%s2314_s6] sm:$0x7] }
 0x1b1   :  { %1788 = vmatpush1.bf16.msra.mxu1 %v1787_v24  ;;  %v937_v24 = vld [vmem:[#allocation7 + $0x280] sm:$0xff]  ;;  %v958_v18 = vrot.slane %v953_v17, %v2263_v63 }
 0x1b2   :  { %1790 = vmatprep.subr.bf16.mxu1 %v1789_v25  ;;  %v940_v25 = vld [vmem:[#allocation7 + $0x298] sm:$0xff] }
 0x1b3   :  { %v1893_v27 = vpack.c.bf16 %v940_v25, %v937_v24  ;;  %v1119_v25 = vld [vmem:[#allocation8 + $0x28] sm:$0xff] }
 0x1b5   :  { %1792 = vmatpush1.bf16.msra.mxu1 %v1791_v30  ;;  %v943_v30 = vld [vmem:[#allocation7 + $0x2b0] sm:$0xff] }
 0x1b6   :  { %1794 = vmatprep.subr.bf16.mxu1 %v1793_v31  ;;  %v946_v31 = vld [vmem:[#allocation7 + $0x2c8] sm:$0xff] }
 0x1b7   :  { %v1897_v33 = vpack.c.bf16 %v946_v31, %v943_v30  ;;  %v1915_v30 = vpack.c.bf16 %v1119_v25, %v1118_v23 }
 0x1b9   :  { %1796 = vmatpush1.bf16.msra.mxu1 %v1795_v37  ;;  %v895_v37 = vld [vmem:[#allocation7 + $0x130] sm:$0xff] }
 0x1ba   :  { %1798 = vmatprep.subr.bf16.mxu1 %v1797_v38  ;;  %v1867_v38 = vpack.c.bf16 %v944_v36, %v941_v35  ;;  %v1899_v40 = vpack.c.bf16 %v898_v39, %v895_v37  ;;  %v1121_v35 = vld [vmem:[#allocation8 + $0x38] sm:$0xff]  ;;  %v1152_v36 = vld [vmem:[#allocation8 + $0x130] sm:$0xff]  ;;  %v1139_v39 = vld [vmem:[#allocation8 + $0xc8] sm:$0xff] }
 0x1bb   :  { %v1153_v37 = vld [vmem:[#allocation8 + $0x138] sm:$0xff] }
 0x1bc   :  { %1868 = vmatpush1.bf16.msra.mxu0 %v1867_v38  ;;  %v1138_v38 = vld [vmem:[#allocation8 + $0xc0] sm:$0xff] }
 0x1bd   :  { %1800 = vmatpush1.bf16.msra.mxu1 %v1799_v44  ;;  %v949_v44 = vld [vmem:[#allocation7 + $0x2e0] sm:$0xff] }
 0x1be   :  { %1802 = vmatprep.subr.bf16.mxu1 %v1801_v45  ;;  %v1869_v45 = vpack.c.bf16 %v951_v43, %v948_v41  ;;  %v1901_v51 = vpack.c.bf16 %v952_v46, %v949_v44  ;;  %v1947_v41 = vpack.c.bf16 %v1153_v37, %v1152_v36  ;;  %v1122_v43 = vld [vmem:[#allocation8 + $0x40] sm:$0xff]  ;;  %v1921_v44 = vpack.c.bf16 %v1139_v39, %v1138_v38 }
 0x1bf   :  { %v1154_v46 = vld [vmem:[#allocation8 + $0x140] sm:$0xff] }
 0x1c0   :  { %1870 = vmatprep.subr.bf16.mxu0 %v1869_v45  ;;  %v1123_v45 = vld [vmem:[#allocation8 + $0x48] sm:$0xff] }
 0x1c1   :  { %1804 = vmatpush1.bf16.msra.mxu1 %v1803_v52  ;;  %v1871_v52 = vpack.c.bf16 %v950_v49, %v947_v47  ;;  %v1155_v47 = vld [vmem:[#allocation8 + $0x148] sm:$0xff]  ;;  %v1140_v49 = vld [vmem:[#allocation8 + $0xd0] sm:$0xff] }
 0x1c2   :  { %1806 = vmatprep.subr.bf16.mxu1 %v1805_v53  ;;  %v901_v53 = vld [vmem:[#allocation7 + $0x160] sm:$0xff] }
 0x1c3   :  { %v1903_v55 = vpack.c.bf16 %v904_v54, %v901_v53  ;;  %1872 = vmatpush1.bf16.msra.mxu0 %v1871_v52  ;;  %v1923_v52 = vpack.c.bf16 %v1123_v45, %v1122_v43  ;;  %v1950_v53 = vpack.c.bf16 %v1155_v47, %v1154_v46  ;;  %v1124_v54 = vld [vmem:[#allocation8 + $0x50] sm:$0xff] }
 0x1c5   :  { %1808 = vmatpush1.bf16.msra.mxu1 %v1807_v58  ;;  %v1905_v58 = vpack.c.bf16 %v1131_v57, %v1130_v56  ;;  %v1125_v56 = vld [vmem:[#allocation8 + $0x58] sm:$0xff]  ;;  %v1156_v57 = vld [vmem:[#allocation8 + $0x150] sm:$0xff] }
 0x1c6   :  { %1874 = vmatprep.subr.bf16.mxu1 %v1873_v59  ;;  %v2115_v59 = vmov 0.0|0.0  }
 0x1c7   :  { %1906 = vmatprep.subr.bf16.mxu0 %v1905_v58  ;;  %v1157_v58 = vld [vmem:[#allocation8 + $0x158] sm:$0xff] }
 0x1c8   :  { %849 = vmatmul.mubr.f32.vlgmr.msra.gmra.mrb[4].mxu1 %v604_v4 }
 0x1c9   :  { %1876 = vmatpush3.bf16.msra.mxu1 %v1875_v3  ;;  %v1114_v3 = vld [vmem:[#allocation8] sm:$0xff] }
 0x1ca   :  { %1878 = vmatprep.subr.bf16.mxu1 %v1877_v5  ;;  %v1907_v13 = vpack.c.bf16 %v1115_v6, %v1114_v3 }
 0x1cd   :  { %1880 = vmatpush3.bf16.msra.mxu1 %v1879_v10  ;;  %v1132_v10 = vld [vmem:[#allocation8 + $0x90] sm:$0xff] }
 0x1ce   :  { %1882 = vmatprep.subr.bf16.mxu1 %v1881_v11  ;;  %v1133_v11 = vld [vmem:[#allocation8 + $0x98] sm:$0xff] }
 0x1d1   :  { %1884 = vmatpush3.bf16.msra.mxu1 %v1883_v15 }
 0x1d2   :  { %1886 = vmatprep.subr.bf16.mxu1 %v1885_v16  ;;  %v1909_v16 = vpack.c.bf16 %v1133_v11, %v1132_v10  ;;  %v1144_v10 = vld [vmem:[#allocation8 + $0xf0] sm:$0xff]  ;;  %v1145_v11 = vld [vmem:[#allocation8 + $0xf8] sm:$0xff] }
 0x1d5   :  { %1888 = vmatpush3.bf16.msra.mxu1 %v1887_v20  ;;  %v1135_v20 = vld [vmem:[#allocation8 + $0xa8] sm:$0xff] }
 0x1d6   :  { %1890 = vmatprep.subr.bf16.mxu1 %v1889_v21  ;;  %v1911_v21 = vpack.c.bf16 %v1117_v60, %v1116_v14  ;;  %v1913_v24 = vpack.c.bf16 %v1135_v20, %v1134_v50  ;;  %v962_v50 = vrot.slane %v953_v17, %v2266_v0  ;;  %v1328_v0 = vld [vmem:[%s2316_s8] ss:$0 sm:$0xff] }
 0x1d9   :  { %1892 = vmatpush3.bf16.msra.mxu1 %v1891_v26  ;;  %v1150_v26 = vld [vmem:[#allocation8 + $0x120] sm:$0xff] }
 0x1da   :  { %1894 = vmatprep.subr.bf16.mxu1 %v1893_v27  ;;  %v1151_v27 = vld [vmem:[#allocation8 + $0x128] sm:$0xff] }
 0x1db   :  { %v1944_v31 = vpack.c.bf16 %v1151_v27, %v1150_v26 }
 0x1dd   :  { %1896 = vmatpush3.bf16.msra.mxu1 %v1895_v42  ;;  %v1120_v42 = vld [vmem:[#allocation8 + $0x30] sm:$0xff] }
 0x1de   :  { %1898 = vmatprep.subr.bf16.mxu1 %v1897_v33  ;;  %v1917_v33 = vpack.c.bf16 %v1137_v29, %v1136_v28 }
 0x1e1   :  { %1900 = vmatpush3.bf16.msra.mxu1 %v1899_v40  ;;  %v1919_v40 = vpack.c.bf16 %v1121_v35, %v1120_v42 }
 0x1e2   :  { %1902 = vmatprep.subr.bf16.mxu1 %v1901_v51  ;;  %v1141_v51 = vld [vmem:[#allocation8 + $0xd8] sm:$0xff] }
 0x1e5   :  { %1904 = vmatpush3.bf16.msra.mxu1 %v1903_v55  ;;  %v1925_v55 = vpack.c.bf16 %v1141_v51, %v1140_v49 }
 0x1e6   :  { %1937 = vmatprep.subr.bf16.mxu1 %v2115_v59 }
 0x29b   :  { %v850_v2 = vpop.f32.mrb[4].mxu1 }
 0x29c   :  { %v1963_v4 = vadd.f32 %v850_v2, %v706_v62  ;;  %v852_v5 = vpop.f32.mrb[5].mxu1  ;;  %v1143_v62 = vld [vmem:[#allocation8 + $0xe8] sm:$0xff]  ;;  %v1953_v2 = vpack.c.bf16 %v1157_v58, %v1156_v57 }
 0x29d   :  { %v1964_v9 = vadd.f32 %v852_v5, %v710_v1  ;;  %v1927_v1 = vpack.c.bf16 %v1125_v56, %v1124_v54  ;;  %v1929_v3 = vpack.c.bf16 %v1143_v62, %v1142_v61  ;;  %v1127_v5 = vld [vmem:[#allocation8 + $0x68] sm:$0xff] }
 0x29e   :  { %v855_v15 = vmax.f32 %v1963_v4, 0.0  ;;  %v1126_v4 = vld [vmem:[#allocation8 + $0x60] sm:$0xff] }
 0x29f   :  { %v856_v12 = vmax.f32 %v1964_v9, 0.0  ;;  %v1931_v6 = vpack.c.bf16 %v1127_v5, %v1126_v4  ;;  %v1956_v9 = vpack.c.bf16 %v1159_v8, %v1158_v7 }
 0x2a1   :  { %1034 = vmatprep.mubr.f32.mxu0 %v856_v12  ;;  %1105 = vmatprep.mubr.f32.mxu1 %v856_v12  ;;  %v1933_v12 = vpack.c.bf16 %v1145_v11, %v1144_v10 }
 0x2a2   :  { %1035 = vmatmul.mubr.f32.vlgmr.msra.gmra.mrb[2].mxu0 %v855_v15  ;;  %1106 = vmatmul.mubr.f32.vlgmr.msra.gmra.mrb[6].mxu1 %v855_v15  ;;  %v1160_v15 = vld [vmem:[#allocation8 + $0x170] sm:$0xff] }
 0x2a3   :  { %1908 = vmatpush3.bf16.msra.mxu0 %v1907_v13  ;;  %1939 = vmatpush3.bf16.msra.mxu1 %v1938_v48  ;;  %v1128_v13 = vld [vmem:[#allocation8 + $0x70] sm:$0xff]  ;;  %v1129_v48 = vld [vmem:[#allocation8 + $0x78] sm:$0xff] }
 0x2a4   :  { %1910 = vmatprep.subr.bf16.mxu0 %v1909_v16  ;;  %1940 = vmatprep.subr.bf16.mxu1 %v2115_v59  ;;  %v1935_v14 = vpack.c.bf16 %v1129_v48, %v1128_v13  ;;  %v1161_v16 = vld [vmem:[#allocation8 + $0x178] sm:$0xff] }
 0x2a5   :  { %v1959_v60 = vpack.c.bf16 %v1161_v16, %v1160_v15  ;;  %1518 = vmatprep.mubr.msk.f32.mxu1 %vm2116_vm0, %v2114_v19 }
 0x2a7   :  { %1912 = vmatpush3.bf16.msra.mxu0 %v1911_v21  ;;  %1942 = vmatpush3.bf16.msra.mxu1 %v1941_v22 }
 0x2a8   :  { %1914 = vmatprep.subr.bf16.mxu0 %v1913_v24  ;;  %1943 = vmatprep.subr.bf16.mxu1 %v2115_v59 }
 0x2ab   :  { %1916 = vmatpush3.bf16.msra.mxu0 %v1915_v30  ;;  %1945 = vmatpush3.bf16.msra.mxu1 %v1944_v31 }
 0x2ac   :  { %1918 = vmatprep.subr.bf16.mxu0 %v1917_v33  ;;  %1946 = vmatprep.subr.bf16.mxu1 %v2115_v59 }
 0x2af   :  { %1920 = vmatpush3.bf16.msra.mxu0 %v1919_v40  ;;  %1948 = vmatpush3.bf16.msra.mxu1 %v1947_v41 }
 0x2b0   :  { %1922 = vmatprep.subr.bf16.mxu0 %v1921_v44  ;;  %1949 = vmatprep.subr.bf16.mxu1 %v2115_v59 }
 0x2b3   :  { %1924 = vmatpush3.bf16.msra.mxu0 %v1923_v52  ;;  %1951 = vmatpush3.bf16.msra.mxu1 %v1950_v53 }
 0x2b4   :  { %1926 = vmatprep.subr.bf16.mxu0 %v1925_v55  ;;  %1952 = vmatprep.subr.bf16.mxu1 %v2115_v59 }
 0x2b7   :  { %1928 = vmatpush3.bf16.msra.mxu0 %v1927_v1  ;;  %1954 = vmatpush3.bf16.msra.mxu1 %v1953_v2 }
 0x2b8   :  { %1930 = vmatprep.subr.bf16.mxu0 %v1929_v3  ;;  %1955 = vmatprep.subr.bf16.mxu1 %v2115_v59 }
 0x2bb   :  { %1932 = vmatpush3.bf16.msra.mxu0 %v1931_v6  ;;  %1957 = vmatpush3.bf16.msra.mxu1 %v1956_v9 }
 0x2bc   :  { %1958 = vmatprep.subr.bf16.mxu1 %v2115_v59  ;;  %1934 = vmatprep.subr.bf16.mxu0 %v1933_v12  ;;  %v966_v59 = vrot.slane %v953_v17, %v293_v32 }
 0x2bf   :  { %1936 = vmatpush3.bf16.msra.mxu0 %v1935_v14  ;;  %1960 = vmatpush3.bf16.msra.mxu1 %v1959_v60 }
 0x375   :  { %v1036_v20 = vpop.f32.mrb[2].mxu0  ;;  %v1431_v21 = vpop.f32.mrb[6].mxu1 }
 0x376   :  { %v1037_v22 = vadd.f32 %v1036_v20, %v958_v18  ;;  %v1038_v23 = vpop.f32.mrb[3].mxu0  ;;  %v1432_v24 = vpop.f32.mrb[7].mxu1 }
 0x377   :  { %v1039_v25 = vadd.f32 %v1038_v23, %v962_v50  ;;  %v1433_v26 = vadd.f32 %v1432_v24, %v1431_v21 }
 0x378   :  { %v1111_v28 = vmax.f32 %v1037_v22, 0.0 }
 0x379   :  { %v1112_v27 = vmax.f32 %v1039_v25, 0.0  ;;  %v1108_v19 = vadd.f32 %v1433_v26, %v966_v59 }
 0x37b   :  { %v1113_v29 = vmax.f32 %v1108_v19, 0.0  ;;  %1233 = vmatprep.mubr.f32.mxu0 %v1112_v27 }
 0x37c   :  { %1234 = vmatmul.mubr.f32.vlgmr.msra.gmra.mrb[4].mxu0 %v1111_v28 }
 0x37d   :  { %1519 = vmatmul.mubr.f32.vlgmr.msra.gmra.mrb[8].mxu1 %v1113_v29 }
 0x44f   :  { %v1466_v63 = vpop.f32.mrb[4].mxu0 }
 0x450   :  { %v1467_v30 = vpop.f32.mrb[5].mxu0  ;;  %v1305_v34 = vpop.f32.mrb[8].mxu1 }
 0x451   :  { %v1468_v32 = vadd.f32 %v1467_v30, %v1466_v63  ;;  %v1520_v31 = vpop.f32.mrb[9].mxu1 }
 0x453   :  { %v1236_v42 = vadd.f32 %v1468_v32, %v1328_v0 }
 0x455   :  { %v1306_v33 = vadd.f32 %v1305_v34, %v1236_v42 }
 0x457   :  { %v1309_v35 = vmax.f32 %v1306_v33, 0.0 }
 0x459   :  { %1310 = vst [vmem:[#allocation10] sm:$0x3] %v1309_v35 }
 0x45a   :  { %2084 = shalt.err (!%p2081_p8)
}
 0x45b   :  { %s2085_s8 = scalar_lea.hbm %s2317_s9, 32 }
 0x45c   :  { %p2086_p9 = scmp.ne.s32.totalorder %s2317_s9, %s2085_s8  ;;  %p2089_p10 = scmp.lt.u32.totalorder %s2085_s8, %s2317_s9 }
 0x45e   :  { %p2091_p11 = pnand %p2089_p10, %p2086_p9 }
 0x460   :  { %2094 = shalt.err (!%p2091_p11)
}
 0x461   :  { %1320 = dma.vmem_to_hbm [thread:$0]  %s1318_s23, 32, %s2317_s9, [#allocation4]  }
 0x462   :  { %2101 = dma.done.wait [#allocation4], 32  }
 0x463   :  { %2102 = vsyncadd [#allocation4], 4294967264 }
 0x464   :  { %1324 = vsyncpa [#allocation3], 1 }
 0x465   :  { %1325 = vsyncpa [#allocation6], 1 }
 0x466   :  { %1326 = vsyncpa [#allocation9], 1 }
 0x467   :  { %1327 = vsyncpa [#allocation4], 1 }

</bundles_post_ra>
